<compile_context>
chip_gen: v7x
topology: tpu7x:2x2x1
jax: 0.10.0
libtpu: 0.0.40
codegen_flags: <defaults>
</compile_context>

<pallas_src>
import numpy as np
import jax
import jax.numpy as jnp
from jax import lax
from jax.experimental import pallas as pl
from jax.experimental.pallas import tpu as pltpu


def gru_kernel(x_ref, w_ih_ref, w_hh_ref, b_ih_ref, b_hh_ref,
               w_fc_ref, b_fc_ref, out_ref, gi_scr, h_scr):
    T, B, E = x_ref.shape
    H = w_hh_ref.shape[0]

    # ---- Hoisted input projection: one big matmul covering every timestep. ----
    x_all = x_ref[...].reshape(T * B, E)                            # (T*B, E)
    gi_all = (jnp.dot(x_all, w_ih_ref[...],
                      preferred_element_type=jnp.float32)
              + b_ih_ref[...])                                       # (T*B, 3H)
    gi_scr[...] = gi_all.reshape(T, B, 3 * H)                        # time-major

    # ---- Sequential GRU recurrence over VMEM-resident hidden state. ----
    h_scr[...] = jnp.zeros_like(h_scr)

    def step(t, carry):
        h_prev = h_scr[...]                                          # (B, H)
        gi = gi_scr[t]                                               # (B, 3H)
        gh = (jnp.dot(h_prev, w_hh_ref[...],
                      preferred_element_type=jnp.float32)
              + b_hh_ref[...])                                       # (B, 3H)

        # PyTorch GRU gate order: r, z, n
        i_r, i_z, i_n = gi[:, :H], gi[:, H:2 * H], gi[:, 2 * H:]
        h_r, h_z, h_n = gh[:, :H], gh[:, H:2 * H], gh[:, 2 * H:]

        r = jax.nn.sigmoid(i_r + h_r)
        z = jax.nn.sigmoid(i_z + h_z)
        n = jnp.tanh(i_n + r * h_n)
        h_scr[...] = (1.0 - z) * n + z * h_prev
        return carry

    lax.fori_loop(0, T, step, 0, unroll=True)

    # ---- Final Linear on the last hidden state (lane-dense padded output). ----
    out_ref[...] = (jnp.dot(h_scr[...], w_fc_ref[...],
                            preferred_element_type=jnp.float32)
                    + b_fc_ref[...]).astype(out_ref.dtype)


def _round_up(x, m):
    return ((x + m - 1) // m) * m


def gru_net_forward(tokens, params):
    """tokens: (B, T) int32 -> (B, output_dim) float32"""
    emb_w = params["embedding"]          # (V, E)
    w_ih = params["w_ih"]                # (E, 3H)
    w_hh = params["w_hh"]                # (H, 3H)
    b_ih = params["b_ih"]                # (1, 3H)
    b_hh = params["b_hh"]                # (1, 3H)
    w_fc = params["w_fc"]                # (H, O)
    b_fc = params["b_fc"]                # (1, O)

    B, T = tokens.shape
    E = emb_w.shape[1]
    H = w_hh.shape[0]
    O = w_fc.shape[1]

    B_pad = _round_up(max(B, 8), 8)          # sublane / MXU-M alignment
    O_pad = _round_up(max(O, 128), 128)      # lane-dense output stores

    tokens_p = jnp.pad(tokens, ((0, B_pad - B), (0, 0)))
    # Gather directly in time-major order: (T, B_pad, E); no transposed copy of the
    # (B, T, E) activations is materialized in HBM.
    x_tbe = jnp.take(emb_w, tokens_p.T, axis=0)

    w_fc_p = jnp.pad(w_fc, ((0, 0), (0, O_pad - O)))
    b_fc_p = jnp.pad(b_fc, ((0, 0), (0, O_pad - O)))

    out_full = pl.pallas_call(
        gru_kernel,
        out_shape=jax.ShapeDtypeStruct((B_pad, O_pad), jnp.float32),
        grid_spec=pltpu.PrefetchScalarGridSpec(
            num_scalar_prefetch=0,
            grid=(1,),
            in_specs=[
                pl.BlockSpec((T, B_pad, E), lambda i: (0, 0, 0)),   # x (time-major)
                pl.BlockSpec((E, 3 * H), lambda i: (0, 0)),         # W_ih
                pl.BlockSpec((H, 3 * H), lambda i: (0, 0)),         # W_hh
                pl.BlockSpec((1, 3 * H), lambda i: (0, 0)),         # b_ih
                pl.BlockSpec((1, 3 * H), lambda i: (0, 0)),         # b_hh
                pl.BlockSpec((H, O_pad), lambda i: (0, 0)),         # W_fc (padded)
                pl.BlockSpec((1, O_pad), lambda i: (0, 0)),         # b_fc (padded)
            ],
            out_specs=pl.BlockSpec((B_pad, O_pad), lambda i: (0, 0)),
            scratch_shapes=[
                pltpu.VMEM((T, B_pad, 3 * H), jnp.float32),   # per-step gate inputs
                pltpu.VMEM((B_pad, H), jnp.float32),          # hidden state
            ],
        ),
        compiler_params=pltpu.CompilerParams(
            dimension_semantics=("arbitrary",)),
    )(x_tbe, w_ih, w_hh, b_ih, b_hh, w_fc_p, b_fc_p)

    return out_full[:B, :O]


def reference_forward(tokens, params):
    """Pure-JAX reference matching torch.nn.GRU semantics (single layer)."""
    emb_w = params["embedding"]
    w_ih, w_hh = params["w_ih"], params["w_hh"]
    b_ih, b_hh = params["b_ih"], params["b_hh"]
    w_fc, b_fc = params["w_fc"], params["b_fc"]
    H = w_hh.shape[0]

    embedded = jnp.take(emb_w, tokens, axis=0)          # (B, T, E)
    B, T, E = embedded.shape
    h = jnp.zeros((B, H), jnp.float32)
    for t in range(T):
        x_t = embedded[:, t, :]
        gi = x_t @ w_ih + b_ih
        gh = h @ w_hh + b_hh
        i_r, i_z, i_n = gi[:, :H], gi[:, H:2 * H], gi[:, 2 * H:]
        h_r, h_z, h_n = gh[:, :H], gh[:, H:2 * H], gh[:, 2 * H:]
        r = jax.nn.sigmoid(i_r + h_r)
        z = jax.nn.sigmoid(i_z + h_z)
        n = jnp.tanh(i_n + r * h_n)
        h = (1.0 - z) * n + z * h
    return h @ w_fc + b_fc


def init_params(key, vocab_size, embed_dim, hidden_dim, output_dim):
    ks = jax.random.split(key, 7)
    scale = 1.0 / np.sqrt(hidden_dim)
    return {
        "embedding": jax.random.normal(ks[0], (vocab_size, embed_dim), jnp.float32),
        # Pre-transposed GRU weights: x @ W_ih, h @ W_hh (gate order r, z, n)
        "w_ih": jax.random.uniform(ks[1], (embed_dim, 3 * hidden_dim), jnp.float32,
                                   -scale, scale),
        "w_hh": jax.random.uniform(ks[2], (hidden_dim, 3 * hidden_dim), jnp.float32,
                                   -scale, scale),
        "b_ih": jax.random.uniform(ks[3], (1, 3 * hidden_dim), jnp.float32, -scale, scale),
        "b_hh": jax.random.uniform(ks[4], (1, 3 * hidden_dim), jnp.float32, -scale, scale),
        "w_fc": jax.random.uniform(ks[5], (hidden_dim, output_dim), jnp.float32,
                                   -scale, scale),
        "b_fc": jax.random.uniform(ks[6], (1, output_dim), jnp.float32, -scale, scale),
    }


if __name__ == "__main__":
    vocab_size = 5000
    embed_dim = 128
    hidden_dim = 128
    output_dim = 3
    B, T = 2, 8

    key = jax.random.PRNGKey(0)
    pkey, tkey = jax.random.split(key)
    params = init_params(pkey, vocab_size, embed_dim, hidden_dim, output_dim)
    tokens = jax.random.randint(tkey, (B, T), 0, vocab_size, dtype=jnp.int32)

    out = jax.block_until_ready(gru_net_forward(tokens, params))
    ref = jax.block_until_ready(reference_forward(tokens, params))

    assert out.shape == (B, output_dim), out.shape
    np.testing.assert_allclose(np.asarray(out), np.asarray(ref), rtol=1e-5, atol=1e-5)
    print("KERNEL_OK")
</pallas_src>

<mosaic_0001>
module attributes {stable_mosaic.version = 11 : i64} {
  func.func @gru_kernel(%arg0: i32, %arg1: memref<8x8x128xf32, #tpu.memory_space<vmem>>, %arg2: memref<128x384xf32, #tpu.memory_space<vmem>>, %arg3: memref<128x384xf32, #tpu.memory_space<vmem>>, %arg4: memref<1x384xf32, #tpu.memory_space<vmem>>, %arg5: memref<1x384xf32, #tpu.memory_space<vmem>>, %arg6: memref<128x128xf32, #tpu.memory_space<vmem>>, %arg7: memref<1x128xf32, #tpu.memory_space<vmem>>, %arg8: memref<8x128xf32, #tpu.memory_space<vmem>>, %arg9: memref<8x8x384xf32, #tpu.memory_space<vmem>>, %arg10: memref<8x128xf32, #tpu.memory_space<vmem>>) attributes {dimension_semantics = [#tpu.dimension_semantics<arbitrary>], iteration_bounds = array<i64: 1>, scalar_prefetch = 0 : i64, scratch_operands = 2 : i64, tpu.core_type = #tpu.core_type<tc>, window_params = [{pipeline_mode = #tpu.pipeline_mode<synchronous>, transform_indices = @transform_0, window_bounds = array<i64: 8, 8, 128>}, {pipeline_mode = #tpu.pipeline_mode<synchronous>, transform_indices = @transform_1, window_bounds = array<i64: 128, 384>}, {pipeline_mode = #tpu.pipeline_mode<synchronous>, transform_indices = @transform_2, window_bounds = array<i64: 128, 384>}, {pipeline_mode = #tpu.pipeline_mode<synchronous>, transform_indices = @transform_3, window_bounds = array<i64: 1, 384>}, {pipeline_mode = #tpu.pipeline_mode<synchronous>, transform_indices = @transform_4, window_bounds = array<i64: 1, 384>}, {pipeline_mode = #tpu.pipeline_mode<synchronous>, transform_indices = @transform_5, window_bounds = array<i64: 128, 128>}, {pipeline_mode = #tpu.pipeline_mode<synchronous>, transform_indices = @transform_6, window_bounds = array<i64: 1, 128>}, {pipeline_mode = #tpu.pipeline_mode<synchronous>, transform_indices = @transform_7, window_bounds = array<i64: 8, 128>}]} {
    %c0 = arith.constant 0 : index
    %c0_0 = arith.constant 0 : index
    %c0_1 = arith.constant 0 : index
    %0 = vector.load %arg1[%c0, %c0_0, %c0_1] : memref<8x8x128xf32, #tpu.memory_space<vmem>>, vector<8x8x128xf32>
    %1 = vector.shape_cast %0 : vector<8x8x128xf32> to vector<64x128xf32>
    %c0_2 = arith.constant 0 : index
    %c0_3 = arith.constant 0 : index
    %2 = vector.load %arg2[%c0_2, %c0_3] : memref<128x384xf32, #tpu.memory_space<vmem>>, vector<128x384xf32>
    %cst = arith.constant dense<0.000000e+00> : vector<64x384xf32>
    %3 = tpu.matmul %1, %2, %cst {dimension_numbers = #tpu.dot_dimension_numbers<[1], [0], [0], [1], [0, 0, 1, 1], [], []>} : vector<64x128xf32>, vector<128x384xf32>, vector<64x384xf32> -> vector<64x384xf32>
    %c0_4 = arith.constant 0 : index
    %c0_5 = arith.constant 0 : index
    %4 = vector.load %arg4[%c0_4, %c0_5] : memref<1x384xf32, #tpu.memory_space<vmem>>, vector<1x384xf32>
    %5 = vector.broadcast %4 : vector<1x384xf32> to vector<64x384xf32>
    %6 = arith.addf %3, %5 : vector<64x384xf32>
    %7 = vector.shape_cast %6 : vector<64x384xf32> to vector<8x8x384xf32>
    %c0_6 = arith.constant 0 : index
    %c0_7 = arith.constant 0 : index
    %c0_8 = arith.constant 0 : index
    %8 = vector.load %arg9[%c0_6, %c0_7, %c0_8] : memref<8x8x384xf32, #tpu.memory_space<vmem>>, vector<8x8x384xf32>
    tpu.vector_store %arg9[%c0_6, %c0_7, %c0_8], %7 {strides = array<i32>} : memref<8x8x384xf32, #tpu.memory_space<vmem>>, vector<8x8x384xf32>,
    %cst_9 = arith.constant 0.000000e+00 : f32
    %9 = vector.broadcast %cst_9 : f32 to vector<8x128xf32>
    %c0_10 = arith.constant 0 : index
    %c0_11 = arith.constant 0 : index
    %10 = vector.load %arg10[%c0_10, %c0_11] : memref<8x128xf32, #tpu.memory_space<vmem>>, vector<8x128xf32>
    tpu.vector_store %arg10[%c0_10, %c0_11], %9 {strides = array<i32>} : memref<8x128xf32, #tpu.memory_space<vmem>>, vector<8x128xf32>,
    %c0_i32 = arith.constant 0 : i32
    %c0_12 = arith.constant 0 : index
    %c0_13 = arith.constant 0 : index
    %11 = vector.load %arg10[%c0_12, %c0_13] : memref<8x128xf32, #tpu.memory_space<vmem>>, vector<8x128xf32>
    %12 = arith.index_cast %c0_i32 : i32 to index
    %c0_14 = arith.constant 0 : index
    %c0_15 = arith.constant 0 : index
    %13 = vector.load %arg9[%12, %c0_14, %c0_15] : memref<8x8x384xf32, #tpu.memory_space<vmem>>, vector<1x8x384xf32>
    %14 = vector.shape_cast %13 : vector<1x8x384xf32> to vector<8x384xf32>
    %c0_16 = arith.constant 0 : index
    %c0_17 = arith.constant 0 : index
    %15 = vector.load %arg3[%c0_16, %c0_17] : memref<128x384xf32, #tpu.memory_space<vmem>>, vector<128x384xf32>
    %cst_18 = arith.constant dense<0.000000e+00> : vector<8x384xf32>
    %16 = tpu.matmul %11, %15, %cst_18 {dimension_numbers = #tpu.dot_dimension_numbers<[1], [0], [0], [1], [0, 0, 1, 1], [], []>} : vector<8x128xf32>, vector<128x384xf32>, vector<8x384xf32> -> vector<8x384xf32>
    %c0_19 = arith.constant 0 : index
    %c0_20 = arith.constant 0 : index
    %17 = vector.load %arg5[%c0_19, %c0_20] : memref<1x384xf32, #tpu.memory_space<vmem>>, vector<1x384xf32>
    %18 = vector.broadcast %17 : vector<1x384xf32> to vector<8x384xf32>
    %19 = arith.addf %16, %18 : vector<8x384xf32>
    %20 = vector.extract_strided_slice %14 {offsets = [0, 0], sizes = [8, 128], strides = [1, 1]} : vector<8x384xf32> to vector<8x128xf32>
    %21 = vector.extract_strided_slice %14 {offsets = [0, 128], sizes = [8, 128], strides = [1, 1]} : vector<8x384xf32> to vector<8x128xf32>
    %22 = vector.extract_strided_slice %14 {offsets = [0, 256], sizes = [8, 128], strides = [1, 1]} : vector<8x384xf32> to vector<8x128xf32>
    %23 = vector.extract_strided_slice %19 {offsets = [0, 0], sizes = [8, 128], strides = [1, 1]} : vector<8x384xf32> to vector<8x128xf32>
    %24 = vector.extract_strided_slice %19 {offsets = [0, 128], sizes = [8, 128], strides = [1, 1]} : vector<8x384xf32> to vector<8x128xf32>
    %25 = vector.extract_strided_slice %19 {offsets = [0, 256], sizes = [8, 128], strides = [1, 1]} : vector<8x384xf32> to vector<8x128xf32>
    %26 = arith.addf %20, %23 : vector<8x128xf32>
    %27 = arith.negf %26 : vector<8x128xf32>
    %28 = math.exp %27 : vector<8x128xf32>
    %cst_21 = arith.constant 1.000000e+00 : f32
    %29 = vector.broadcast %cst_21 : f32 to vector<8x128xf32>
    %30 = arith.addf %29, %28 : vector<8x128xf32>
    %31 = arith.divf %29, %30 : vector<8x128xf32>
    %32 = arith.addf %21, %24 : vector<8x128xf32>
    %33 = arith.negf %32 : vector<8x128xf32>
    %34 = math.exp %33 : vector<8x128xf32>
    %cst_22 = arith.constant 1.000000e+00 : f32
    %35 = vector.broadcast %cst_22 : f32 to vector<8x128xf32>
    %36 = arith.addf %35, %34 : vector<8x128xf32>
    %37 = arith.divf %35, %36 : vector<8x128xf32>
    %38 = arith.mulf %31, %25 : vector<8x128xf32>
    %39 = arith.addf %22, %38 : vector<8x128xf32>
    %40 = math.tanh %39 : vector<8x128xf32>
    %cst_23 = arith.constant 1.000000e+00 : f32
    %41 = vector.broadcast %cst_23 : f32 to vector<8x128xf32>
    %42 = arith.subf %41, %37 : vector<8x128xf32>
    %43 = arith.mulf %42, %40 : vector<8x128xf32>
    %44 = arith.mulf %37, %11 : vector<8x128xf32>
    %45 = arith.addf %43, %44 : vector<8x128xf32>
    %c0_24 = arith.constant 0 : index
    %c0_25 = arith.constant 0 : index
    %46 = vector.load %arg10[%c0_24, %c0_25] : memref<8x128xf32, #tpu.memory_space<vmem>>, vector<8x128xf32>
    tpu.vector_store %arg10[%c0_24, %c0_25], %45 {strides = array<i32>} : memref<8x128xf32, #tpu.memory_space<vmem>>, vector<8x128xf32>,
    %c1_i32 = arith.constant 1 : i32
    %c0_26 = arith.constant 0 : index
    %c0_27 = arith.constant 0 : index
    %47 = vector.load %arg10[%c0_26, %c0_27] : memref<8x128xf32, #tpu.memory_space<vmem>>, vector<8x128xf32>
    %48 = arith.index_cast %c1_i32 : i32 to index
    %c0_28 = arith.constant 0 : index
    %c0_29 = arith.constant 0 : index
    %49 = vector.load %arg9[%48, %c0_28, %c0_29] : memref<8x8x384xf32, #tpu.memory_space<vmem>>, vector<1x8x384xf32>
    %50 = vector.shape_cast %49 : vector<1x8x384xf32> to vector<8x384xf32>
    %c0_30 = arith.constant 0 : index
    %c0_31 = arith.constant 0 : index
    %51 = vector.load %arg3[%c0_30, %c0_31] : memref<128x384xf32, #tpu.memory_space<vmem>>, vector<128x384xf32>
    %cst_32 = arith.constant dense<0.000000e+00> : vector<8x384xf32>
    %52 = tpu.matmul %47, %51, %cst_32 {dimension_numbers = #tpu.dot_dimension_numbers<[1], [0], [0], [1], [0, 0, 1, 1], [], []>} : vector<8x128xf32>, vector<128x384xf32>, vector<8x384xf32> -> vector<8x384xf32>
    %c0_33 = arith.constant 0 : index
    %c0_34 = arith.constant 0 : index
    %53 = vector.load %arg5[%c0_33, %c0_34] : memref<1x384xf32, #tpu.memory_space<vmem>>, vector<1x384xf32>
    %54 = vector.broadcast %53 : vector<1x384xf32> to vector<8x384xf32>
    %55 = arith.addf %52, %54 : vector<8x384xf32>
    %56 = vector.extract_strided_slice %50 {offsets = [0, 0], sizes = [8, 128], strides = [1, 1]} : vector<8x384xf32> to vector<8x128xf32>
    %57 = vector.extract_strided_slice %50 {offsets = [0, 128], sizes = [8, 128], strides = [1, 1]} : vector<8x384xf32> to vector<8x128xf32>
    %58 = vector.extract_strided_slice %50 {offsets = [0, 256], sizes = [8, 128], strides = [1, 1]} : vector<8x384xf32> to vector<8x128xf32>
    %59 = vector.extract_strided_slice %55 {offsets = [0, 0], sizes = [8, 128], strides = [1, 1]} : vector<8x384xf32> to vector<8x128xf32>
    %60 = vector.extract_strided_slice %55 {offsets = [0, 128], sizes = [8, 128], strides = [1, 1]} : vector<8x384xf32> to vector<8x128xf32>
    %61 = vector.extract_strided_slice %55 {offsets = [0, 256], sizes = [8, 128], strides = [1, 1]} : vector<8x384xf32> to vector<8x128xf32>
    %62 = arith.addf %56, %59 : vector<8x128xf32>
    %63 = arith.negf %62 : vector<8x128xf32>
    %64 = math.exp %63 : vector<8x128xf32>
    %cst_35 = arith.constant 1.000000e+00 : f32
    %65 = vector.broadcast %cst_35 : f32 to vector<8x128xf32>
    %66 = arith.addf %65, %64 : vector<8x128xf32>
    %67 = arith.divf %65, %66 : vector<8x128xf32>
    %68 = arith.addf %57, %60 : vector<8x128xf32>
    %69 = arith.negf %68 : vector<8x128xf32>
    %70 = math.exp %69 : vector<8x128xf32>
    %cst_36 = arith.constant 1.000000e+00 : f32
    %71 = vector.broadcast %cst_36 : f32 to vector<8x128xf32>
    %72 = arith.addf %71, %70 : vector<8x128xf32>
    %73 = arith.divf %71, %72 : vector<8x128xf32>
    %74 = arith.mulf %67, %61 : vector<8x128xf32>
    %75 = arith.addf %58, %74 : vector<8x128xf32>
    %76 = math.tanh %75 : vector<8x128xf32>
    %cst_37 = arith.constant 1.000000e+00 : f32
    %77 = vector.broadcast %cst_37 : f32 to vector<8x128xf32>
    %78 = arith.subf %77, %73 : vector<8x128xf32>
    %79 = arith.mulf %78, %76 : vector<8x128xf32>
    %80 = arith.mulf %73, %47 : vector<8x128xf32>
    %81 = arith.addf %79, %80 : vector<8x128xf32>
    %c0_38 = arith.constant 0 : index
    %c0_39 = arith.constant 0 : index
    %82 = vector.load %arg10[%c0_38, %c0_39] : memref<8x128xf32, #tpu.memory_space<vmem>>, vector<8x128xf32>
    tpu.vector_store %arg10[%c0_38, %c0_39], %81 {strides = array<i32>} : memref<8x128xf32, #tpu.memory_space<vmem>>, vector<8x128xf32>,
    %c2_i32 = arith.constant 2 : i32
    %c0_40 = arith.constant 0 : index
    %c0_41 = arith.constant 0 : index
    %83 = vector.load %arg10[%c0_40, %c0_41] : memref<8x128xf32, #tpu.memory_space<vmem>>, vector<8x128xf32>
    %84 = arith.index_cast %c2_i32 : i32 to index
    %c0_42 = arith.constant 0 : index
    %c0_43 = arith.constant 0 : index
    %85 = vector.load %arg9[%84, %c0_42, %c0_43] : memref<8x8x384xf32, #tpu.memory_space<vmem>>, vector<1x8x384xf32>
    %86 = vector.shape_cast %85 : vector<1x8x384xf32> to vector<8x384xf32>
    %c0_44 = arith.constant 0 : index
    %c0_45 = arith.constant 0 : index
    %87 = vector.load %arg3[%c0_44, %c0_45] : memref<128x384xf32, #tpu.memory_space<vmem>>, vector<128x384xf32>
    %cst_46 = arith.constant dense<0.000000e+00> : vector<8x384xf32>
    %88 = tpu.matmul %83, %87, %cst_46 {dimension_numbers = #tpu.dot_dimension_numbers<[1], [0], [0], [1], [0, 0, 1, 1], [], []>} : vector<8x128xf32>, vector<128x384xf32>, vector<8x384xf32> -> vector<8x384xf32>
    %c0_47 = arith.constant 0 : index
    %c0_48 = arith.constant 0 : index
    %89 = vector.load %arg5[%c0_47, %c0_48] : memref<1x384xf32, #tpu.memory_space<vmem>>, vector<1x384xf32>
    %90 = vector.broadcast %89 : vector<1x384xf32> to vector<8x384xf32>
    %91 = arith.addf %88, %90 : vector<8x384xf32>
    %92 = vector.extract_strided_slice %86 {offsets = [0, 0], sizes = [8, 128], strides = [1, 1]} : vector<8x384xf32> to vector<8x128xf32>
    %93 = vector.extract_strided_slice %86 {offsets = [0, 128], sizes = [8, 128], strides = [1, 1]} : vector<8x384xf32> to vector<8x128xf32>
    %94 = vector.extract_strided_slice %86 {offsets = [0, 256], sizes = [8, 128], strides = [1, 1]} : vector<8x384xf32> to vector<8x128xf32>
    %95 = vector.extract_strided_slice %91 {offsets = [0, 0], sizes = [8, 128], strides = [1, 1]} : vector<8x384xf32> to vector<8x128xf32>
    %96 = vector.extract_strided_slice %91 {offsets = [0, 128], sizes = [8, 128], strides = [1, 1]} : vector<8x384xf32> to vector<8x128xf32>
    %97 = vector.extract_strided_slice %91 {offsets = [0, 256], sizes = [8, 128], strides = [1, 1]} : vector<8x384xf32> to vector<8x128xf32>
    %98 = arith.addf %92, %95 : vector<8x128xf32>
    %99 = arith.negf %98 : vector<8x128xf32>
    %100 = math.exp %99 : vector<8x128xf32>
    %cst_49 = arith.constant 1.000000e+00 : f32
    %101 = vector.broadcast %cst_49 : f32 to vector<8x128xf32>
    %102 = arith.addf %101, %100 : vector<8x128xf32>
    %103 = arith.divf %101, %102 : vector<8x128xf32>
    %104 = arith.addf %93, %96 : vector<8x128xf32>
    %105 = arith.negf %104 : vector<8x128xf32>
    %106 = math.exp %105 : vector<8x128xf32>
    %cst_50 = arith.constant 1.000000e+00 : f32
    %107 = vector.broadcast %cst_50 : f32 to vector<8x128xf32>
    %108 = arith.addf %107, %106 : vector<8x128xf32>
    %109 = arith.divf %107, %108 : vector<8x128xf32>
    %110 = arith.mulf %103, %97 : vector<8x128xf32>
    %111 = arith.addf %94, %110 : vector<8x128xf32>
    %112 = math.tanh %111 : vector<8x128xf32>
    %cst_51 = arith.constant 1.000000e+00 : f32
    %113 = vector.broadcast %cst_51 : f32 to vector<8x128xf32>
    %114 = arith.subf %113, %109 : vector<8x128xf32>
    %115 = arith.mulf %114, %112 : vector<8x128xf32>
    %116 = arith.mulf %109, %83 : vector<8x128xf32>
    %117 = arith.addf %115, %116 : vector<8x128xf32>
    %c0_52 = arith.constant 0 : index
    %c0_53 = arith.constant 0 : index
    %118 = vector.load %arg10[%c0_52, %c0_53] : memref<8x128xf32, #tpu.memory_space<vmem>>, vector<8x128xf32>
    tpu.vector_store %arg10[%c0_52, %c0_53], %117 {strides = array<i32>} : memref<8x128xf32, #tpu.memory_space<vmem>>, vector<8x128xf32>,
    %c3_i32 = arith.constant 3 : i32
    %c0_54 = arith.constant 0 : index
    %c0_55 = arith.constant 0 : index
    %119 = vector.load %arg10[%c0_54, %c0_55] : memref<8x128xf32, #tpu.memory_space<vmem>>, vector<8x128xf32>
    %120 = arith.index_cast %c3_i32 : i32 to index
    %c0_56 = arith.constant 0 : index
    %c0_57 = arith.constant 0 : index
    %121 = vector.load %arg9[%120, %c0_56, %c0_57] : memref<8x8x384xf32, #tpu.memory_space<vmem>>, vector<1x8x384xf32>
    %122 = vector.shape_cast %121 : vector<1x8x384xf32> to vector<8x384xf32>
    %c0_58 = arith.constant 0 : index
    %c0_59 = arith.constant 0 : index
    %123 = vector.load %arg3[%c0_58, %c0_59] : memref<128x384xf32, #tpu.memory_space<vmem>>, vector<128x384xf32>
    %cst_60 = arith.constant dense<0.000000e+00> : vector<8x384xf32>
    %124 = tpu.matmul %119, %123, %cst_60 {dimension_numbers = #tpu.dot_dimension_numbers<[1], [0], [0], [1], [0, 0, 1, 1], [], []>} : vector<8x128xf32>, vector<128x384xf32>, vector<8x384xf32> -> vector<8x384xf32>
    %c0_61 = arith.constant 0 : index
    %c0_62 = arith.constant 0 : index
    %125 = vector.load %arg5[%c0_61, %c0_62] : memref<1x384xf32, #tpu.memory_space<vmem>>, vector<1x384xf32>
    %126 = vector.broadcast %125 : vector<1x384xf32> to vector<8x384xf32>
    %127 = arith.addf %124, %126 : vector<8x384xf32>
    %128 = vector.extract_strided_slice %122 {offsets = [0, 0], sizes = [8, 128], strides = [1, 1]} : vector<8x384xf32> to vector<8x128xf32>
    %129 = vector.extract_strided_slice %122 {offsets = [0, 128], sizes = [8, 128], strides = [1, 1]} : vector<8x384xf32> to vector<8x128xf32>
    %130 = vector.extract_strided_slice %122 {offsets = [0, 256], sizes = [8, 128], strides = [1, 1]} : vector<8x384xf32> to vector<8x128xf32>
    %131 = vector.extract_strided_slice %127 {offsets = [0, 0], sizes = [8, 128], strides = [1, 1]} : vector<8x384xf32> to vector<8x128xf32>
    %132 = vector.extract_strided_slice %127 {offsets = [0, 128], sizes = [8, 128], strides = [1, 1]} : vector<8x384xf32> to vector<8x128xf32>
    %133 = vector.extract_strided_slice %127 {offsets = [0, 256], sizes = [8, 128], strides = [1, 1]} : vector<8x384xf32> to vector<8x128xf32>
    %134 = arith.addf %128, %131 : vector<8x128xf32>
    %135 = arith.negf %134 : vector<8x128xf32>
    %136 = math.exp %135 : vector<8x128xf32>
    %cst_63 = arith.constant 1.000000e+00 : f32
    %137 = vector.broadcast %cst_63 : f32 to vector<8x128xf32>
    %138 = arith.addf %137, %136 : vector<8x128xf32>
    %139 = arith.divf %137, %138 : vector<8x128xf32>
    %140 = arith.addf %129, %132 : vector<8x128xf32>
    %141 = arith.negf %140 : vector<8x128xf32>
    %142 = math.exp %141 : vector<8x128xf32>
    %cst_64 = arith.constant 1.000000e+00 : f32
    %143 = vector.broadcast %cst_64 : f32 to vector<8x128xf32>
    %144 = arith.addf %143, %142 : vector<8x128xf32>
    %145 = arith.divf %143, %144 : vector<8x128xf32>
    %146 = arith.mulf %139, %133 : vector<8x128xf32>
    %147 = arith.addf %130, %146 : vector<8x128xf32>
    %148 = math.tanh %147 : vector<8x128xf32>
    %cst_65 = arith.constant 1.000000e+00 : f32
    %149 = vector.broadcast %cst_65 : f32 to vector<8x128xf32>
    %150 = arith.subf %149, %145 : vector<8x128xf32>
    %151 = arith.mulf %150, %148 : vector<8x128xf32>
    %152 = arith.mulf %145, %119 : vector<8x128xf32>
    %153 = arith.addf %151, %152 : vector<8x128xf32>
    %c0_66 = arith.constant 0 : index
    %c0_67 = arith.constant 0 : index
    %154 = vector.load %arg10[%c0_66, %c0_67] : memref<8x128xf32, #tpu.memory_space<vmem>>, vector<8x128xf32>
    tpu.vector_store %arg10[%c0_66, %c0_67], %153 {strides = array<i32>} : memref<8x128xf32, #tpu.memory_space<vmem>>, vector<8x128xf32>,
    %c4_i32 = arith.constant 4 : i32
    %c0_68 = arith.constant 0 : index
    %c0_69 = arith.constant 0 : index
    %155 = vector.load %arg10[%c0_68, %c0_69] : memref<8x128xf32, #tpu.memory_space<vmem>>, vector<8x128xf32>
    %156 = arith.index_cast %c4_i32 : i32 to index
    %c0_70 = arith.constant 0 : index
    %c0_71 = arith.constant 0 : index
    %157 = vector.load %arg9[%156, %c0_70, %c0_71] : memref<8x8x384xf32, #tpu.memory_space<vmem>>, vector<1x8x384xf32>
    %158 = vector.shape_cast %157 : vector<1x8x384xf32> to vector<8x384xf32>
    %c0_72 = arith.constant 0 : index
    %c0_73 = arith.constant 0 : index
    %159 = vector.load %arg3[%c0_72, %c0_73] : memref<128x384xf32, #tpu.memory_space<vmem>>, vector<128x384xf32>
    %cst_74 = arith.constant dense<0.000000e+00> : vector<8x384xf32>
    %160 = tpu.matmul %155, %159, %cst_74 {dimension_numbers = #tpu.dot_dimension_numbers<[1], [0], [0], [1], [0, 0, 1, 1], [], []>} : vector<8x128xf32>, vector<128x384xf32>, vector<8x384xf32> -> vector<8x384xf32>
    %c0_75 = arith.constant 0 : index
    %c0_76 = arith.constant 0 : index
    %161 = vector.load %arg5[%c0_75, %c0_76] : memref<1x384xf32, #tpu.memory_space<vmem>>, vector<1x384xf32>
    %162 = vector.broadcast %161 : vector<1x384xf32> to vector<8x384xf32>
    %163 = arith.addf %160, %162 : vector<8x384xf32>
    %164 = vector.extract_strided_slice %158 {offsets = [0, 0], sizes = [8, 128], strides = [1, 1]} : vector<8x384xf32> to vector<8x128xf32>
    %165 = vector.extract_strided_slice %158 {offsets = [0, 128], sizes = [8, 128], strides = [1, 1]} : vector<8x384xf32> to vector<8x128xf32>
    %166 = vector.extract_strided_slice %158 {offsets = [0, 256], sizes = [8, 128], strides = [1, 1]} : vector<8x384xf32> to vector<8x128xf32>
    %167 = vector.extract_strided_slice %163 {offsets = [0, 0], sizes = [8, 128], strides = [1, 1]} : vector<8x384xf32> to vector<8x128xf32>
    %168 = vector.extract_strided_slice %163 {offsets = [0, 128], sizes = [8, 128], strides = [1, 1]} : vector<8x384xf32> to vector<8x128xf32>
    %169 = vector.extract_strided_slice %163 {offsets = [0, 256], sizes = [8, 128], strides = [1, 1]} : vector<8x384xf32> to vector<8x128xf32>
    %170 = arith.addf %164, %167 : vector<8x128xf32>
    %171 = arith.negf %170 : vector<8x128xf32>
    %172 = math.exp %171 : vector<8x128xf32>
    %cst_77 = arith.constant 1.000000e+00 : f32
    %173 = vector.broadcast %cst_77 : f32 to vector<8x128xf32>
    %174 = arith.addf %173, %172 : vector<8x128xf32>
    %175 = arith.divf %173, %174 : vector<8x128xf32>
    %176 = arith.addf %165, %168 : vector<8x128xf32>
    %177 = arith.negf %176 : vector<8x128xf32>
    %178 = math.exp %177 : vector<8x128xf32>
    %cst_78 = arith.constant 1.000000e+00 : f32
    %179 = vector.broadcast %cst_78 : f32 to vector<8x128xf32>
    %180 = arith.addf %179, %178 : vector<8x128xf32>
    %181 = arith.divf %179, %180 : vector<8x128xf32>
    %182 = arith.mulf %175, %169 : vector<8x128xf32>
    %183 = arith.addf %166, %182 : vector<8x128xf32>
    %184 = math.tanh %183 : vector<8x128xf32>
    %cst_79 = arith.constant 1.000000e+00 : f32
    %185 = vector.broadcast %cst_79 : f32 to vector<8x128xf32>
    %186 = arith.subf %185, %181 : vector<8x128xf32>
    %187 = arith.mulf %186, %184 : vector<8x128xf32>
    %188 = arith.mulf %181, %155 : vector<8x128xf32>
    %189 = arith.addf %187, %188 : vector<8x128xf32>
    %c0_80 = arith.constant 0 : index
    %c0_81 = arith.constant 0 : index
    %190 = vector.load %arg10[%c0_80, %c0_81] : memref<8x128xf32, #tpu.memory_space<vmem>>, vector<8x128xf32>
    tpu.vector_store %arg10[%c0_80, %c0_81], %189 {strides = array<i32>} : memref<8x128xf32, #tpu.memory_space<vmem>>, vector<8x128xf32>,
    %c5_i32 = arith.constant 5 : i32
    %c0_82 = arith.constant 0 : index
    %c0_83 = arith.constant 0 : index
    %191 = vector.load %arg10[%c0_82, %c0_83] : memref<8x128xf32, #tpu.memory_space<vmem>>, vector<8x128xf32>
    %192 = arith.index_cast %c5_i32 : i32 to index
    %c0_84 = arith.constant 0 : index
    %c0_85 = arith.constant 0 : index
    %193 = vector.load %arg9[%192, %c0_84, %c0_85] : memref<8x8x384xf32, #tpu.memory_space<vmem>>, vector<1x8x384xf32>
    %194 = vector.shape_cast %193 : vector<1x8x384xf32> to vector<8x384xf32>
    %c0_86 = arith.constant 0 : index
    %c0_87 = arith.constant 0 : index
    %195 = vector.load %arg3[%c0_86, %c0_87] : memref<128x384xf32, #tpu.memory_space<vmem>>, vector<128x384xf32>
    %cst_88 = arith.constant dense<0.000000e+00> : vector<8x384xf32>
    %196 = tpu.matmul %191, %195, %cst_88 {dimension_numbers = #tpu.dot_dimension_numbers<[1], [0], [0], [1], [0, 0, 1, 1], [], []>} : vector<8x128xf32>, vector<128x384xf32>, vector<8x384xf32> -> vector<8x384xf32>
    %c0_89 = arith.constant 0 : index
    %c0_90 = arith.constant 0 : index
    %197 = vector.load %arg5[%c0_89, %c0_90] : memref<1x384xf32, #tpu.memory_space<vmem>>, vector<1x384xf32>
    %198 = vector.broadcast %197 : vector<1x384xf32> to vector<8x384xf32>
    %199 = arith.addf %196, %198 : vector<8x384xf32>
    %200 = vector.extract_strided_slice %194 {offsets = [0, 0], sizes = [8, 128], strides = [1, 1]} : vector<8x384xf32> to vector<8x128xf32>
    %201 = vector.extract_strided_slice %194 {offsets = [0, 128], sizes = [8, 128], strides = [1, 1]} : vector<8x384xf32> to vector<8x128xf32>
    %202 = vector.extract_strided_slice %194 {offsets = [0, 256], sizes = [8, 128], strides = [1, 1]} : vector<8x384xf32> to vector<8x128xf32>
    %203 = vector.extract_strided_slice %199 {offsets = [0, 0], sizes = [8, 128], strides = [1, 1]} : vector<8x384xf32> to vector<8x128xf32>
    %204 = vector.extract_strided_slice %199 {offsets = [0, 128], sizes = [8, 128], strides = [1, 1]} : vector<8x384xf32> to vector<8x128xf32>
    %205 = vector.extract_strided_slice %199 {offsets = [0, 256], sizes = [8, 128], strides = [1, 1]} : vector<8x384xf32> to vector<8x128xf32>
    %206 = arith.addf %200, %203 : vector<8x128xf32>
    %207 = arith.negf %206 : vector<8x128xf32>
    %208 = math.exp %207 : vector<8x128xf32>
    %cst_91 = arith.constant 1.000000e+00 : f32
    %209 = vector.broadcast %cst_91 : f32 to vector<8x128xf32>
    %210 = arith.addf %209, %208 : vector<8x128xf32>
    %211 = arith.divf %209, %210 : vector<8x128xf32>
    %212 = arith.addf %201, %204 : vector<8x128xf32>
    %213 = arith.negf %212 : vector<8x128xf32>
    %214 = math.exp %213 : vector<8x128xf32>
    %cst_92 = arith.constant 1.000000e+00 : f32
    %215 = vector.broadcast %cst_92 : f32 to vector<8x128xf32>
    %216 = arith.addf %215, %214 : vector<8x128xf32>
    %217 = arith.divf %215, %216 : vector<8x128xf32>
    %218 = arith.mulf %211, %205 : vector<8x128xf32>
    %219 = arith.addf %202, %218 : vector<8x128xf32>
    %220 = math.tanh %219 : vector<8x128xf32>
    %cst_93 = arith.constant 1.000000e+00 : f32
    %221 = vector.broadcast %cst_93 : f32 to vector<8x128xf32>
    %222 = arith.subf %221, %217 : vector<8x128xf32>
    %223 = arith.mulf %222, %220 : vector<8x128xf32>
    %224 = arith.mulf %217, %191 : vector<8x128xf32>
    %225 = arith.addf %223, %224 : vector<8x128xf32>
    %c0_94 = arith.constant 0 : index
    %c0_95 = arith.constant 0 : index
    %226 = vector.load %arg10[%c0_94, %c0_95] : memref<8x128xf32, #tpu.memory_space<vmem>>, vector<8x128xf32>
    tpu.vector_store %arg10[%c0_94, %c0_95], %225 {strides = array<i32>} : memref<8x128xf32, #tpu.memory_space<vmem>>, vector<8x128xf32>,
    %c6_i32 = arith.constant 6 : i32
    %c0_96 = arith.constant 0 : index
    %c0_97 = arith.constant 0 : index
    %227 = vector.load %arg10[%c0_96, %c0_97] : memref<8x128xf32, #tpu.memory_space<vmem>>, vector<8x128xf32>
    %228 = arith.index_cast %c6_i32 : i32 to index
    %c0_98 = arith.constant 0 : index
    %c0_99 = arith.constant 0 : index
    %229 = vector.load %arg9[%228, %c0_98, %c0_99] : memref<8x8x384xf32, #tpu.memory_space<vmem>>, vector<1x8x384xf32>
    %230 = vector.shape_cast %229 : vector<1x8x384xf32> to vector<8x384xf32>
    %c0_100 = arith.constant 0 : index
    %c0_101 = arith.constant 0 : index
    %231 = vector.load %arg3[%c0_100, %c0_101] : memref<128x384xf32, #tpu.memory_space<vmem>>, vector<128x384xf32>
    %cst_102 = arith.constant dense<0.000000e+00> : vector<8x384xf32>
    %232 = tpu.matmul %227, %231, %cst_102 {dimension_numbers = #tpu.dot_dimension_numbers<[1], [0], [0], [1], [0, 0, 1, 1], [], []>} : vector<8x128xf32>, vector<128x384xf32>, vector<8x384xf32> -> vector<8x384xf32>
    %c0_103 = arith.constant 0 : index
    %c0_104 = arith.constant 0 : index
    %233 = vector.load %arg5[%c0_103, %c0_104] : memref<1x384xf32, #tpu.memory_space<vmem>>, vector<1x384xf32>
    %234 = vector.broadcast %233 : vector<1x384xf32> to vector<8x384xf32>
    %235 = arith.addf %232, %234 : vector<8x384xf32>
    %236 = vector.extract_strided_slice %230 {offsets = [0, 0], sizes = [8, 128], strides = [1, 1]} : vector<8x384xf32> to vector<8x128xf32>
    %237 = vector.extract_strided_slice %230 {offsets = [0, 128], sizes = [8, 128], strides = [1, 1]} : vector<8x384xf32> to vector<8x128xf32>
    %238 = vector.extract_strided_slice %230 {offsets = [0, 256], sizes = [8, 128], strides = [1, 1]} : vector<8x384xf32> to vector<8x128xf32>
    %239 = vector.extract_strided_slice %235 {offsets = [0, 0], sizes = [8, 128], strides = [1, 1]} : vector<8x384xf32> to vector<8x128xf32>
    %240 = vector.extract_strided_slice %235 {offsets = [0, 128], sizes = [8, 128], strides = [1, 1]} : vector<8x384xf32> to vector<8x128xf32>
    %241 = vector.extract_strided_slice %235 {offsets = [0, 256], sizes = [8, 128], strides = [1, 1]} : vector<8x384xf32> to vector<8x128xf32>
    %242 = arith.addf %236, %239 : vector<8x128xf32>
    %243 = arith.negf %242 : vector<8x128xf32>
    %244 = math.exp %243 : vector<8x128xf32>
    %cst_105 = arith.constant 1.000000e+00 : f32
    %245 = vector.broadcast %cst_105 : f32 to vector<8x128xf32>
    %246 = arith.addf %245, %244 : vector<8x128xf32>
    %247 = arith.divf %245, %246 : vector<8x128xf32>
    %248 = arith.addf %237, %240 : vector<8x128xf32>
    %249 = arith.negf %248 : vector<8x128xf32>
    %250 = math.exp %249 : vector<8x128xf32>
    %cst_106 = arith.constant 1.000000e+00 : f32
    %251 = vector.broadcast %cst_106 : f32 to vector<8x128xf32>
    %252 = arith.addf %251, %250 : vector<8x128xf32>
    %253 = arith.divf %251, %252 : vector<8x128xf32>
    %254 = arith.mulf %247, %241 : vector<8x128xf32>
    %255 = arith.addf %238, %254 : vector<8x128xf32>
    %256 = math.tanh %255 : vector<8x128xf32>
    %cst_107 = arith.constant 1.000000e+00 : f32
    %257 = vector.broadcast %cst_107 : f32 to vector<8x128xf32>
    %258 = arith.subf %257, %253 : vector<8x128xf32>
    %259 = arith.mulf %258, %256 : vector<8x128xf32>
    %260 = arith.mulf %253, %227 : vector<8x128xf32>
    %261 = arith.addf %259, %260 : vector<8x128xf32>
    %c0_108 = arith.constant 0 : index
    %c0_109 = arith.constant 0 : index
    %262 = vector.load %arg10[%c0_108, %c0_109] : memref<8x128xf32, #tpu.memory_space<vmem>>, vector<8x128xf32>
    tpu.vector_store %arg10[%c0_108, %c0_109], %261 {strides = array<i32>} : memref<8x128xf32, #tpu.memory_space<vmem>>, vector<8x128xf32>,
    %c7_i32 = arith.constant 7 : i32
    %c0_110 = arith.constant 0 : index
    %c0_111 = arith.constant 0 : index
    %263 = vector.load %arg10[%c0_110, %c0_111] : memref<8x128xf32, #tpu.memory_space<vmem>>, vector<8x128xf32>
    %264 = arith.index_cast %c7_i32 : i32 to index
    %c0_112 = arith.constant 0 : index
    %c0_113 = arith.constant 0 : index
    %265 = vector.load %arg9[%264, %c0_112, %c0_113] : memref<8x8x384xf32, #tpu.memory_space<vmem>>, vector<1x8x384xf32>
    %266 = vector.shape_cast %265 : vector<1x8x384xf32> to vector<8x384xf32>
    %c0_114 = arith.constant 0 : index
    %c0_115 = arith.constant 0 : index
    %267 = vector.load %arg3[%c0_114, %c0_115] : memref<128x384xf32, #tpu.memory_space<vmem>>, vector<128x384xf32>
    %cst_116 = arith.constant dense<0.000000e+00> : vector<8x384xf32>
    %268 = tpu.matmul %263, %267, %cst_116 {dimension_numbers = #tpu.dot_dimension_numbers<[1], [0], [0], [1], [0, 0, 1, 1], [], []>} : vector<8x128xf32>, vector<128x384xf32>, vector<8x384xf32> -> vector<8x384xf32>
    %c0_117 = arith.constant 0 : index
    %c0_118 = arith.constant 0 : index
    %269 = vector.load %arg5[%c0_117, %c0_118] : memref<1x384xf32, #tpu.memory_space<vmem>>, vector<1x384xf32>
    %270 = vector.broadcast %269 : vector<1x384xf32> to vector<8x384xf32>
    %271 = arith.addf %268, %270 : vector<8x384xf32>
    %272 = vector.extract_strided_slice %266 {offsets = [0, 0], sizes = [8, 128], strides = [1, 1]} : vector<8x384xf32> to vector<8x128xf32>
    %273 = vector.extract_strided_slice %266 {offsets = [0, 128], sizes = [8, 128], strides = [1, 1]} : vector<8x384xf32> to vector<8x128xf32>
    %274 = vector.extract_strided_slice %266 {offsets = [0, 256], sizes = [8, 128], strides = [1, 1]} : vector<8x384xf32> to vector<8x128xf32>
    %275 = vector.extract_strided_slice %271 {offsets = [0, 0], sizes = [8, 128], strides = [1, 1]} : vector<8x384xf32> to vector<8x128xf32>
    %276 = vector.extract_strided_slice %271 {offsets = [0, 128], sizes = [8, 128], strides = [1, 1]} : vector<8x384xf32> to vector<8x128xf32>
    %277 = vector.extract_strided_slice %271 {offsets = [0, 256], sizes = [8, 128], strides = [1, 1]} : vector<8x384xf32> to vector<8x128xf32>
    %278 = arith.addf %272, %275 : vector<8x128xf32>
    %279 = arith.negf %278 : vector<8x128xf32>
    %280 = math.exp %279 : vector<8x128xf32>
    %cst_119 = arith.constant 1.000000e+00 : f32
    %281 = vector.broadcast %cst_119 : f32 to vector<8x128xf32>
    %282 = arith.addf %281, %280 : vector<8x128xf32>
    %283 = arith.divf %281, %282 : vector<8x128xf32>
    %284 = arith.addf %273, %276 : vector<8x128xf32>
    %285 = arith.negf %284 : vector<8x128xf32>
    %286 = math.exp %285 : vector<8x128xf32>
    %cst_120 = arith.constant 1.000000e+00 : f32
    %287 = vector.broadcast %cst_120 : f32 to vector<8x128xf32>
    %288 = arith.addf %287, %286 : vector<8x128xf32>
    %289 = arith.divf %287, %288 : vector<8x128xf32>
    %290 = arith.mulf %283, %277 : vector<8x128xf32>
    %291 = arith.addf %274, %290 : vector<8x128xf32>
    %292 = math.tanh %291 : vector<8x128xf32>
    %cst_121 = arith.constant 1.000000e+00 : f32
    %293 = vector.broadcast %cst_121 : f32 to vector<8x128xf32>
    %294 = arith.subf %293, %289 : vector<8x128xf32>
    %295 = arith.mulf %294, %292 : vector<8x128xf32>
    %296 = arith.mulf %289, %263 : vector<8x128xf32>
    %297 = arith.addf %295, %296 : vector<8x128xf32>
    %c0_122 = arith.constant 0 : index
    %c0_123 = arith.constant 0 : index
    %298 = vector.load %arg10[%c0_122, %c0_123] : memref<8x128xf32, #tpu.memory_space<vmem>>, vector<8x128xf32>
    tpu.vector_store %arg10[%c0_122, %c0_123], %297 {strides = array<i32>} : memref<8x128xf32, #tpu.memory_space<vmem>>, vector<8x128xf32>,
    %c8_i32 = arith.constant 8 : i32
    %c0_124 = arith.constant 0 : index
    %c0_125 = arith.constant 0 : index
    %299 = vector.load %arg10[%c0_124, %c0_125] : memref<8x128xf32, #tpu.memory_space<vmem>>, vector<8x128xf32>
    %c0_126 = arith.constant 0 : index
    %c0_127 = arith.constant 0 : index
    %300 = vector.load %arg6[%c0_126, %c0_127] : memref<128x128xf32, #tpu.memory_space<vmem>>, vector<128x128xf32>
    %cst_128 = arith.constant dense<0.000000e+00> : vector<8x128xf32>
    %301 = tpu.matmul %299, %300, %cst_128 {dimension_numbers = #tpu.dot_dimension_numbers<[1], [0], [0], [1], [0, 0, 1, 1], [], []>} : vector<8x128xf32>, vector<128x128xf32>, vector<8x128xf32> -> vector<8x128xf32>
    %c0_129 = arith.constant 0 : index
    %c0_130 = arith.constant 0 : index
    %302 = vector.load %arg7[%c0_129, %c0_130] : memref<1x128xf32, #tpu.memory_space<vmem>>, vector<1x128xf32>
    %303 = vector.broadcast %302 : vector<1x128xf32> to vector<8x128xf32>
    %304 = arith.addf %301, %303 : vector<8x128xf32>
    %c0_131 = arith.constant 0 : index
    %c0_132 = arith.constant 0 : index
    %305 = vector.load %arg8[%c0_131, %c0_132] : memref<8x128xf32, #tpu.memory_space<vmem>>, vector<8x128xf32>
    tpu.vector_store %arg8[%c0_131, %c0_132], %304 {strides = array<i32>} : memref<8x128xf32, #tpu.memory_space<vmem>>, vector<8x128xf32>,
    return
  }
  func.func @transform_0(%arg0: i32) -> (i32, i32, i32) {
    %c0_i32 = arith.constant 0 : i32
    %c0_i32_0 = arith.constant 0 : i32
    %c0_i32_1 = arith.constant 0 : i32
    %c0_i32_2 = arith.constant 0 : i32
    return %c0_i32, %c0_i32_0, %c0_i32_1 : i32, i32, i32
  }
  func.func @transform_1(%arg0: i32) -> (i32, i32) {
    %c0_i32 = arith.constant 0 : i32
    %c0_i32_0 = arith.constant 0 : i32
    %c0_i32_1 = arith.constant 0 : i32
    return %c0_i32, %c0_i32_0 : i32, i32
  }
  func.func @transform_2(%arg0: i32) -> (i32, i32) {
    %c0_i32 = arith.constant 0 : i32
    %c0_i32_0 = arith.constant 0 : i32
    %c0_i32_1 = arith.constant 0 : i32
    return %c0_i32, %c0_i32_0 : i32, i32
  }
  func.func @transform_3(%arg0: i32) -> (i32, i32) {
    %c0_i32 = arith.constant 0 : i32
    %c0_i32_0 = arith.constant 0 : i32
    %c0_i32_1 = arith.constant 0 : i32
    return %c0_i32, %c0_i32_0 : i32, i32
  }
  func.func @transform_4(%arg0: i32) -> (i32, i32) {
    %c0_i32 = arith.constant 0 : i32
    %c0_i32_0 = arith.constant 0 : i32
    %c0_i32_1 = arith.constant 0 : i32
    return %c0_i32, %c0_i32_0 : i32, i32
  }
  func.func @transform_5(%arg0: i32) -> (i32, i32) {
    %c0_i32 = arith.constant 0 : i32
    %c0_i32_0 = arith.constant 0 : i32
    %c0_i32_1 = arith.constant 0 : i32
    return %c0_i32, %c0_i32_0 : i32, i32
  }
  func.func @transform_6(%arg0: i32) -> (i32, i32) {
    %c0_i32 = arith.constant 0 : i32
    %c0_i32_0 = arith.constant 0 : i32
    %c0_i32_1 = arith.constant 0 : i32
    return %c0_i32, %c0_i32_0 : i32, i32
  }
  func.func @transform_7(%arg0: i32) -> (i32, i32) {
    %c0_i32 = arith.constant 0 : i32
    %c0_i32_0 = arith.constant 0 : i32
    %c0_i32_1 = arith.constant 0 : i32
    return %c0_i32, %c0_i32_0 : i32, i32
  }
}

</mosaic_0001>

<bundles_post_ra>
// kernel: tpu_custom_call.1
= control target key start
LH: loop header
LB: loop body
LE: loop exit
PB: predicated region body
PF: predicated region fallthrough
CT: control target
= control target key end

     0   :  { %12 = vsyncpa [#allocation5], 0  ;;  %s4390_s0 = inlined_call_operand.hbm [shape: f32[8,8,128], index: 0, kind: input, shape index: {}]   ;;  %s4391_s1 = inlined_call_operand.hbm [shape: f32[128,384], index: 1, kind: input, shape index: {}]   ;;  %s4392_s2 = inlined_call_operand.hbm [shape: f32[128,384], index: 2, kind: input, shape index: {}]   ;;  %s4393_s3 = inlined_call_operand.vmem [shape: f32[1,384], index: 3, kind: input, shape index: {}]   ;;  %s4394_s4 = inlined_call_operand.vmem [shape: f32[1,384], index: 4, kind: input, shape index: {}]   ;;  %s4395_s5 = inlined_call_operand.hbm [shape: f32[128,128], index: 5, kind: input, shape index: {}]   ;;  %s4396_s6 = inlined_call_operand.vmem [shape: f32[1,128], index: 6, kind: input, shape index: {}]   ;;  %s4397_s7 = inlined_call_operand.hbm [shape: f32[8,128], index: 7, kind: output, shape index: {}]  }
   0x1   :  { %13 = vsyncpa [#allocation8], 0 }
   0x2   :  { %14 = vsyncpa [#allocation11], 0 }
   0x3   :  { %15 = vsyncpa [#allocation6], 0  ;;  %s3720_s24 = smov [#allocation7]   ;;  %s3602_s28 = scalar_lea.hbm %s4391_s1, 6144 }
   0x4   :  { %s33_s25 = sshll.u32 %s3720_s24, 4  ;;  %p3603_p0 = scmp.ne.s32.totalorder %s4391_s1, %s3602_s28  ;;  %s34_s25 = int_to_ptr.vmem [resolvable:$true] %s33_s25 }
   0x5   :  { %p3606_p1 = scmp.lt.u32.totalorder %s3602_s28, %s4391_s1 }
   0x7   :  { %p3608_p2 = pnand %p3606_p1, %p3603_p0 }
   0x9   :  { %3611 = shalt.err (!%p3608_p2)
}
   0xa   :  { %s3612_s10 = scalar_lea.vmem %s34_s25, 6144  ;;  %p3617_p4 = scmp.lt.s32.totalorder %s34_s25, %s34_s25 }
   0xb   :  { %p3613_p3 = scmp.ne.s32.totalorder %s34_s25, %s3612_s10  ;;  %p3618_p5 = scmp.lt.s32.totalorder %s3612_s10, %s3612_s10 }
   0xd   :  { %p3619_p6 = por %p3618_p5, %p3617_p4 }
   0xf   :  { %p3620_p7 = pnand %p3619_p6, %p3613_p3 }
  0x11   :  { %3623 = shalt.err (!%p3620_p7)
}
  0x12   :  { %s3721_s11 = smov 384   ;;  %s3722_s12 = smov 24  }
  0x13   :  { %39 = dma.hbm_to_vmem [thread:$0]  %s4391_s1, 6144, %s34_s25, [#allocation8], %s3721_s11, %s3721_s11, %s3722_s12  }
  0x14   :  { %s3723_s15 = smov [#allocation4]   ;;  %s3624_s19 = scalar_lea.hbm %s4390_s0, 1024 }
  0x15   :  { %s21_s16 = sshll.u32 %s3723_s15, 4  ;;  %p3625_p8 = scmp.ne.s32.totalorder %s4390_s0, %s3624_s19  ;;  %s22_s16 = int_to_ptr.vmem [resolvable:$true] %s21_s16 }
  0x16   :  { %p3628_p9 = scmp.lt.u32.totalorder %s3624_s19, %s4390_s0 }
  0x18   :  { %p3630_p10 = pnand %p3628_p9, %p3625_p8 }
  0x1a   :  { %3633 = shalt.err (!%p3630_p10)
}
  0x1b   :  { %s3634_s24 = scalar_lea.vmem %s22_s16, 1024  ;;  %p3639_p12 = scmp.lt.s32.totalorder %s22_s16, %s22_s16 }
  0x1c   :  { %p3635_p11 = scmp.ne.s32.totalorder %s22_s16, %s3634_s24  ;;  %p3640_p13 = scmp.lt.s32.totalorder %s3634_s24, %s3634_s24 }
  0x1e   :  { %p3641_p0 = por %p3640_p13, %p3639_p12 }
  0x20   :  { %p3642_p1 = pnand %p3641_p0, %p3635_p11 }
  0x22   :  { %3645 = shalt.err (!%p3642_p1)
}
  0x23   :  { %s3724_s1 = smov 128   ;;  %s3725_s25 = smov 8  }
  0x24   :  { %27 = dma.hbm_to_vmem [thread:$0]  %s4390_s0, 1024, %s22_s16, [#allocation5], %s3724_s1, %s3724_s1, %s3725_s25  }
  0x25   :  { %s3726_s28 = smov [#allocation9]   ;;  %s3727_s30 = smov [#allocation10]  }
  0x26   :  { %s45_s29 = sshll.u32 %s3726_s28, 4  ;;  %s61_s8 = sshll.u32 %s3727_s30, 4  ;;  %s46_s29 = int_to_ptr.vmem [resolvable:$true] %s45_s29  ;;  %s3802_s8 = int_to_ptr.vmem [resolvable:$true] %s61_s8 }
  0x27   :  { %s3646_s13 = scalar_lea.hbm %s4392_s2, 6144 }
  0x28   :  { %p3647_p2 = scmp.ne.s32.totalorder %s4392_s2, %s3646_s13  ;;  %p3650_p3 = scmp.lt.u32.totalorder %s3646_s13, %s4392_s2 }
  0x2a   :  { %p3652_p4 = pnand %p3650_p3, %p3647_p2 }
  0x2c   :  { %3655 = shalt.err (!%p3652_p4)
}
  0x2d   :  { %s3656_s0 = scalar_lea.vmem %s46_s29, 6144  ;;  %p3661_p6 = scmp.lt.s32.totalorder %s46_s29, %s46_s29 }
  0x2e   :  { %p3657_p5 = scmp.ne.s32.totalorder %s46_s29, %s3656_s0  ;;  %p3662_p7 = scmp.lt.s32.totalorder %s3656_s0, %s3656_s0 }
  0x30   :  { %p3663_p8 = por %p3662_p7, %p3661_p6 }
  0x32   :  { %p3664_p9 = pnand %p3663_p8, %p3657_p5 }
  0x34   :  { %3667 = shalt.err (!%p3664_p9)
}
  0x35   :  { %51 = dma.hbm_to_vmem [thread:$0]  %s4392_s2, 6144, %s46_s29, [#allocation8], %s3721_s11, %s3721_s11, %s3722_s12  }
  0x36   :  { %s3668_s22 = scalar_lea.hbm %s4395_s5, 2048 }
  0x37   :  { %p3669_p10 = scmp.ne.s32.totalorder %s4395_s5, %s3668_s22  ;;  %p3672_p11 = scmp.lt.u32.totalorder %s3668_s22, %s4395_s5 }
  0x39   :  { %p3674_p12 = pnand %p3672_p11, %p3669_p10 }
  0x3b   :  { %3677 = shalt.err (!%p3674_p12)
}
  0x3c   :  { %s3678_s28 = scalar_lea.vmem %s3802_s8, 2048  ;;  %p3683_p0 = scmp.lt.s32.totalorder %s3802_s8, %s3802_s8 }
  0x3d   :  { %p3679_p13 = scmp.ne.s32.totalorder %s3802_s8, %s3678_s28  ;;  %p3684_p1 = scmp.lt.s32.totalorder %s3678_s28, %s3678_s28 }
  0x3f   :  { %p3685_p2 = por %p3684_p1, %p3683_p0 }
  0x41   :  { %p3686_p3 = pnand %p3685_p2, %p3679_p13 }
  0x43   :  { %3689 = shalt.err (!%p3686_p3)
}
  0x44   :  { %67 = dma.hbm_to_vmem [thread:$0]  %s4395_s5, 2048, %s3802_s8, [#allocation11], %s3724_s1, %s3724_s1, %s3725_s25  }
  0x45   :  { %3712 = dma.done.wait [#allocation5], 1024  }
  0x46   :  { %3713 = vsyncadd [#allocation5], 4294966272 }
  0x47   :  { %3714 = dma.done.wait [#allocation8], 12288  }
  0x48   :  { %3715 = vsyncadd [#allocation8], 4294955008 }
  0x49   :  { %3716 = dma.done.wait [#allocation11], 2048  }
  0x4a   :  { %3717 = vsyncadd [#allocation11], 4294965248  ;;  %v3728_v0 = vmov 0.0   ;;  %v91_v1 = vld [vmem:[#allocation7 + $0x8] sm:$0xff]  ;;  %v94_v2 = vld [vmem:[#allocation7 + $0x20] sm:$0xff]  ;;  %vm3730_vm0 = vmmov 0  }
  0x4b   :  { %219 = vmatprep.mubr.f32.mxu0 %v3728_v0  ;;  %v90_v3 = vld [vmem:[#allocation7] sm:$0xff]  ;;  %v2926_v4 = vpack.c.bf16 %v94_v2, %v91_v1  ;;  %v93_v5 = vld [vmem:[#allocation7 + $0x18] sm:$0xff]  ;;  %v100_v7 = vld [vmem:[#allocation7 + $0x50] sm:$0xff]  ;;  %s3731_s21 = smov [#allocation12]  }
  0x4c   :  { %v97_v6 = vld [vmem:[#allocation7 + $0x38] sm:$0xff]  ;;  %v2928_v8 = vpack.c.bf16 %v93_v5, %v90_v3  ;;  %v96_v10 = vld [vmem:[#allocation7 + $0x30] sm:$0xff]  ;;  %v99_v11 = vld [vmem:[#allocation7 + $0x48] sm:$0xff]  ;;  %s2362_s22 = sshll.u32 %s3731_s21, 4  ;;  %s2363_s22 = int_to_ptr.vmem [resolvable:$true] %s2362_s22 }
  0x4d   :  { %v2930_v9 = vpack.c.bf16 %v100_v7, %v97_v6  ;;  %v103_v12 = vld [vmem:[#allocation7 + $0x68] sm:$0xff]  ;;  %2927 = vmatprep.subr.bf16.mxu0 %v2926_v4  ;;  %v106_v13 = vld [vmem:[#allocation7 + $0x80] sm:$0xff]  ;;  %v2932_v14 = vpack.c.bf16 %v99_v11, %v96_v10  ;;  %v105_v17 = vld [vmem:[#allocation7 + $0x78] sm:$0xff]  ;;  %s3690_s23 = scalar_lea.vmem %s2363_s22, 128  ;;  %p3695_p5 = scmp.lt.s32.totalorder %s2363_s22, %s2363_s22 }
  0x4e   :  { %2929 = vmatpush1.bf16.msra.mxu0 %v2928_v8  ;;  %v2934_v15 = vpack.c.bf16 %v106_v13, %v103_v12  ;;  %v102_v16 = vld [vmem:[#allocation7 + $0x60] sm:$0xff]  ;;  %v109_v18 = vld [vmem:[#allocation7 + $0x98] sm:$0xff]  ;;  %v112_v19 = vld [vmem:[#allocation7 + $0xb0] sm:$0xff]  ;;  %p3691_p4 = scmp.ne.s32.totalorder %s2363_s22, %s3690_s23  ;;  %p3696_p6 = scmp.lt.s32.totalorder %s3690_s23, %s3690_s23 }
  0x4f   :  { %2931 = vmatprep.subr.bf16.mxu0 %v2930_v9  ;;  %v2936_v20 = vpack.c.bf16 %v105_v17, %v102_v16  ;;  %v108_v21 = vld [vmem:[#allocation7 + $0x90] sm:$0xff]  ;;  %v2938_v22 = vpack.c.bf16 %v112_v19, %v109_v18  ;;  %v111_v23 = vld [vmem:[#allocation7 + $0xa8] sm:$0xff]  ;;  %v118_v27 = vld [vmem:[#allocation7 + $0xe0] sm:$0xff] }
  0x50   :  { %v92_v24 = vld [vmem:[#allocation7 + $0x10] sm:$0xff]  ;;  %v95_v25 = vld [vmem:[#allocation7 + $0x28] sm:$0xff]  ;;  %v98_v29 = vld [vmem:[#allocation7 + $0x40] sm:$0xff]  ;;  %v2940_v31 = vpack.c.bf16 %v111_v23, %v108_v21  ;;  %p3697_p7 = por %p3696_p6, %p3695_p5 }
  0x51   :  { %v115_v26 = vld [vmem:[#allocation7 + $0xc8] sm:$0xff]  ;;  %v2958_v28 = vpack.c.bf16 %v95_v25, %v92_v24  ;;  %v101_v30 = vld [vmem:[#allocation7 + $0x58] sm:$0xff]  ;;  %v114_v32 = vld [vmem:[#allocation7 + $0xc0] sm:$0xff] }
  0x52   :  { %2933 = vmatpush1.bf16.msra.mxu0 %v2932_v14  ;;  %v2962_v33 = vpack.c.bf16 %v101_v30, %v98_v29  ;;  %v2942_v34 = vpack.c.bf16 %v118_v27, %v115_v26  ;;  %v117_v35 = vld [vmem:[#allocation7 + $0xd8] sm:$0xff]  ;;  %v3840_v36 = vld [vmem:[#allocation4] sm:$0xff]  ;;  %v104_v37 = vld [vmem:[#allocation7 + $0x70] sm:$0xff]  ;;  %p3698_p8 = pnand %p3697_p7, %p3691_p4 }
  0x53   :  { %2935 = vmatprep.subr.bf16.mxu0 %v2934_v15  ;;  %2959 = vmatprep.subr.bf16.mxu1 %v2958_v28  ;;  %v121_v38 = vld [vmem:[#allocation7 + $0xf8] sm:$0xff]  ;;  %v124_v39 = vld [vmem:[#allocation7 + $0x110] sm:$0xff]  ;;  %v107_v40 = vld [vmem:[#allocation7 + $0x88] sm:$0xff]  ;;  %v2944_v42 = vpack.c.bf16 %v117_v35, %v114_v32 }
  0x54   :  { %2961 = vmatpush3.bf16.msra.mxu1 %v2958_v28  ;;  %2599 = vmatprep.mubr.f32.mxu1 %v3840_v36  ;;  %v2966_v41 = vpack.c.bf16 %v107_v40, %v104_v37  ;;  %v110_v43 = vld [vmem:[#allocation7 + $0xa0] sm:$0xff]  ;;  %v113_v44 = vld [vmem:[#allocation7 + $0xb8] sm:$0xff]  ;;  %v2946_v45 = vpack.c.bf16 %v124_v39, %v121_v38  ;;  %v120_v46 = vld [vmem:[#allocation7 + $0xf0] sm:$0xff]  ;;  %v3729_v40 = vmov 0.0|0.0  }
  0x55   :  { %2963 = vmatprep.subr.bf16.mxu1 %v2962_v33  ;;  %v123_v47 = vld [vmem:[#allocation7 + $0x108] sm:$0xff]  ;;  %v130_v49 = vld [vmem:[#allocation7 + $0x140] sm:$0xff]  ;;  %v2970_v50 = vpack.c.bf16 %v113_v44, %v110_v43  ;;  %v116_v51 = vld [vmem:[#allocation7 + $0xd0] sm:$0xff] }
  0x56   :  { %2937 = vmatpush1.bf16.msra.mxu0 %v2936_v20  ;;  %v127_v48 = vld [vmem:[#allocation7 + $0x128] sm:$0xff]  ;;  %v2948_v53 = vpack.c.bf16 %v123_v47, %v120_v46  ;;  %v126_v55 = vld [vmem:[#allocation7 + $0x120] sm:$0xff]  ;;  %v129_v56 = vld [vmem:[#allocation7 + $0x138] sm:$0xff] }
  0x57   :  { %2939 = vmatprep.subr.bf16.mxu0 %v2938_v22  ;;  %v119_v52 = vld [vmem:[#allocation7 + $0xe8] sm:$0xff]  ;;  %v2950_v54 = vpack.c.bf16 %v130_v49, %v127_v48  ;;  %v133_v57 = vld [vmem:[#allocation7 + $0x158] sm:$0xff]  ;;  %v136_v58 = vld [vmem:[#allocation7 + $0x170] sm:$0xff]  ;;  %v2952_v62 = vpack.c.bf16 %v129_v56, %v126_v55 }
  0x58   :  { %2965 = vmatpush3.bf16.msra.mxu1 %v2962_v33  ;;  %v2974_v59 = vpack.c.bf16 %v119_v52, %v116_v51  ;;  %v122_v60 = vld [vmem:[#allocation7 + $0x100] sm:$0xff]  ;;  %v125_v61 = vld [vmem:[#allocation7 + $0x118] sm:$0xff]  ;;  %v2954_v63 = vpack.c.bf16 %v136_v58, %v133_v57  ;;  %v132_v1 = vld [vmem:[#allocation7 + $0x150] sm:$0xff] }
  0x59   :  { %2967 = vmatprep.subr.bf16.mxu1 %v2966_v41  ;;  %v135_v2 = vld [vmem:[#allocation7 + $0x168] sm:$0xff]  ;;  %v406_v4 = vld [vmem:[#allocation9 + $0x20] sm:$0xff]  ;;  %v2978_v5 = vpack.c.bf16 %v125_v61, %v122_v60  ;;  %v128_v6 = vld [vmem:[#allocation7 + $0x130] sm:$0xff] }
  0x5a   :  { %2941 = vmatpush1.bf16.msra.mxu0 %v2940_v31  ;;  %v403_v3 = vld [vmem:[#allocation9 + $0x8] sm:$0xff]  ;;  %v2956_v8 = vpack.c.bf16 %v135_v2, %v132_v1  ;;  %v402_v10 = vld [vmem:[#allocation9] sm:$0xff]  ;;  %v405_v11 = vld [vmem:[#allocation9 + $0x18] sm:$0xff] }
  0x5b   :  { %2943 = vmatprep.subr.bf16.mxu0 %v2942_v34  ;;  %v131_v7 = vld [vmem:[#allocation7 + $0x148] sm:$0xff]  ;;  %v3843_v9 = vpack.c.bf16 %v406_v4, %v403_v3  ;;  %v409_v12 = vld [vmem:[#allocation9 + $0x38] sm:$0xff]  ;;  %v412_v13 = vld [vmem:[#allocation9 + $0x50] sm:$0xff]  ;;  %v3845_v17 = vpack.c.bf16 %v405_v11, %v402_v10 }
  0x5c   :  { %2969 = vmatpush3.bf16.msra.mxu1 %v2966_v41  ;;  %v2982_v14 = vpack.c.bf16 %v131_v7, %v128_v6  ;;  %v134_v15 = vld [vmem:[#allocation7 + $0x160] sm:$0xff]  ;;  %v137_v16 = vld [vmem:[#allocation7 + $0x178] sm:$0xff]  ;;  %v3848_v18 = vpack.c.bf16 %v412_v13, %v409_v12  ;;  %v408_v19 = vld [vmem:[#allocation9 + $0x30] sm:$0xff] }
  0x5d   :  { %2971 = vmatprep.subr.bf16.mxu1 %v2970_v50  ;;  %v411_v20 = vld [vmem:[#allocation9 + $0x48] sm:$0xff]  ;;  %v418_v22 = vld [vmem:[#allocation9 + $0x80] sm:$0xff]  ;;  %v2986_v23 = vpack.c.bf16 %v137_v16, %v134_v15  ;;  %v417_v28 = vld [vmem:[#allocation9 + $0x78] sm:$0xff] }
  0x5e   :  { %2945 = vmatpush1.bf16.msra.mxu0 %v2944_v42  ;;  %v415_v21 = vld [vmem:[#allocation9 + $0x68] sm:$0xff]  ;;  %v3853_v25 = vpack.c.bf16 %v411_v20, %v408_v19  ;;  %v414_v27 = vld [vmem:[#allocation9 + $0x60] sm:$0xff]  ;;  %v421_v29 = vld [vmem:[#allocation9 + $0x98] sm:$0xff] }
  0x5f   :  { %2947 = vmatprep.subr.bf16.mxu0 %v2946_v45  ;;  %v83_v24 = vld [vmem:[#allocation4 + $0x8] sm:$0xff]  ;;  %v3856_v26 = vpack.c.bf16 %v418_v22, %v415_v21  ;;  %v424_v30 = vld [vmem:[#allocation9 + $0xb0] sm:$0xff]  ;;  %v3860_v34 = vpack.c.bf16 %v417_v28, %v414_v27  ;;  %v430_v39 = vld [vmem:[#allocation9 + $0xe0] sm:$0xff] }
  0x60   :  { %2973 = vmatpush3.bf16.msra.mxu1 %v2970_v50  ;;  %v404_v31 = vld [vmem:[#allocation9 + $0x10] sm:$0xff]  ;;  %v407_v32 = vld [vmem:[#allocation9 + $0x28] sm:$0xff]  ;;  %v3863_v35 = vpack.c.bf16 %v424_v30, %v421_v29  ;;  %v410_v42 = vld [vmem:[#allocation9 + $0x40] sm:$0xff] }
  0x61   :  { %2975 = vmatprep.subr.bf16.mxu1 %v2974_v59  ;;  %v84_v33 = vld [vmem:[#allocation4 + $0x10] sm:$0xff]  ;;  %v423_v37 = vld [vmem:[#allocation9 + $0xa8] sm:$0xff]  ;;  %v3866_v41 = vpack.c.bf16 %v407_v32, %v404_v31  ;;  %v413_v43 = vld [vmem:[#allocation9 + $0x58] sm:$0xff] }
  0x62   :  { %2949 = vmatpush1.bf16.msra.mxu0 %v2948_v53  ;;  %v427_v38 = vld [vmem:[#allocation9 + $0xc8] sm:$0xff]  ;;  %v85_v44 = vld [vmem:[#allocation4 + $0x18] sm:$0xff]  ;;  %v426_v47 = vld [vmem:[#allocation9 + $0xc0] sm:$0xff]  ;;  %v3876_v51 = vpack.c.bf16 %v413_v43, %v410_v42 }
  0x63   :  { %2951 = vmatprep.subr.bf16.mxu0 %v2950_v54  ;;  %v3873_v46 = vpack.c.bf16 %v430_v39, %v427_v38  ;;  %v429_v48 = vld [vmem:[#allocation9 + $0xd8] sm:$0xff]  ;;  %v436_v50 = vld [vmem:[#allocation9 + $0x110] sm:$0xff]  ;;  %v419_v53 = vld [vmem:[#allocation9 + $0x88] sm:$0xff] }
  0x64   :  { %2977 = vmatpush3.bf16.msra.mxu1 %v2974_v59  ;;  %v433_v49 = vld [vmem:[#allocation9 + $0xf8] sm:$0xff]  ;;  %v416_v52 = vld [vmem:[#allocation9 + $0x70] sm:$0xff]  ;;  %v86_v54 = vld [vmem:[#allocation4 + $0x20] sm:$0xff]  ;;  %v3881_v55 = vpack.c.bf16 %v429_v48, %v426_v47 }
  0x65   :  { %2979 = vmatprep.subr.bf16.mxu1 %v2978_v5  ;;  %v3884_v56 = vpack.c.bf16 %v436_v50, %v433_v49  ;;  %v432_v57 = vld [vmem:[#allocation9 + $0xf0] sm:$0xff]  ;;  %v435_v58 = vld [vmem:[#allocation9 + $0x108] sm:$0xff]  ;;  %v442_v60 = vld [vmem:[#allocation9 + $0x140] sm:$0xff]  ;;  %v3887_v61 = vpack.c.bf16 %v419_v53, %v416_v52 }
  0x66   :  { %2953 = vmatpush1.bf16.msra.mxu0 %v2952_v62  ;;  %v439_v59 = vld [vmem:[#allocation9 + $0x128] sm:$0xff]  ;;  %v422_v62 = vld [vmem:[#allocation9 + $0xa0] sm:$0xff]  ;;  %v3892_v2 = vpack.c.bf16 %v435_v58, %v432_v57  ;;  %v88_v3 = vld [vmem:[#allocation4 + $0x30] sm:$0xff] }
  0x67   :  { %2955 = vmatprep.subr.bf16.mxu0 %v2954_v63  ;;  %v425_v63 = vld [vmem:[#allocation9 + $0xb8] sm:$0xff]  ;;  %v87_v1 = vld [vmem:[#allocation4 + $0x28] sm:$0xff]  ;;  %v3895_v4 = vpack.c.bf16 %v442_v60, %v439_v59  ;;  %v428_v11 = vld [vmem:[#allocation9 + $0xd0] sm:$0xff] }
  0x68   :  { %2981 = vmatpush3.bf16.msra.mxu1 %v2978_v5  ;;  %v438_v5 = vld [vmem:[#allocation9 + $0x120] sm:$0xff]  ;;  %v441_v6 = vld [vmem:[#allocation9 + $0x138] sm:$0xff]  ;;  %v3898_v10 = vpack.c.bf16 %v425_v63, %v422_v62  ;;  %v431_v12 = vld [vmem:[#allocation9 + $0xe8] sm:$0xff] }
  0x69   :  { %2983 = vmatprep.subr.bf16.mxu1 %v2982_v14  ;;  %v445_v7 = vld [vmem:[#allocation9 + $0x158] sm:$0xff]  ;;  %v3903_v13 = vpack.c.bf16 %v441_v6, %v438_v5  ;;  %v444_v16 = vld [vmem:[#allocation9 + $0x150] sm:$0xff]  ;;  %v447_v19 = vld [vmem:[#allocation9 + $0x168] sm:$0xff]  ;;  %v3909_v20 = vpack.c.bf16 %v431_v12, %v428_v11 }
  0x6a   :  { %2957 = vmatpush1.bf16.msra.mxu0 %v2956_v8  ;;  %v448_v8 = vld [vmem:[#allocation9 + $0x170] sm:$0xff]  ;;  %v434_v21 = vld [vmem:[#allocation9 + $0x100] sm:$0xff]  ;;  %v437_v22 = vld [vmem:[#allocation9 + $0x118] sm:$0xff] }
  0x6b   :  { %2991 = vmatprep.subr.bf16.mxu0 %v3843_v9  ;;  %v3906_v15 = vpack.c.bf16 %v448_v8, %v445_v7  ;;  %v440_v27 = vld [vmem:[#allocation9 + $0x130] sm:$0xff]  ;;  %v443_v28 = vld [vmem:[#allocation9 + $0x148] sm:$0xff]  ;;  %v446_v30 = vld [vmem:[#allocation9 + $0x160] sm:$0xff] }
  0x6c   :  { %2985 = vmatpush3.bf16.msra.mxu1 %v2982_v14  ;;  %v89_v14 = vld [vmem:[#allocation4 + $0x38] sm:$0xff]  ;;  %v3927_v29 = vpack.c.bf16 %v443_v28, %v440_v27  ;;  %v138_v38 = vld [vmem:[%s4393_s3] sm:$0x7] }
  0x6d   :  { %220 = vmatmul.mubr.f32.vlgmr.msra.gmra.mrb[0].mxu0 %v3840_v36  ;;  %2987 = vmatprep.subr.bf16.mxu1 %v2986_v23  ;;  %v420_v36 = vld [vmem:[#allocation9 + $0x90] sm:$0xff]  ;;  %v449_v31 = vld [vmem:[#allocation9 + $0x178] sm:$0xff]  ;;  %v450_v59 = vld [vmem:[%s4394_s4] sm:$0x7] }
  0x6e   :  { %2993 = vmatpush1.bf16.msra.mxu0 %v3845_v17  ;;  %225 = vmatprep.mubr.f32.mxu0 %v3728_v0  ;;  %v3870_v45 = vpack.c.bf16 %v423_v37, %v420_v36  ;;  %v3935_v32 = vpack.c.bf16 %v449_v31, %v446_v30 }
  0x6f   :  { %2995 = vmatprep.subr.bf16.mxu0 %v3848_v18 }
  0x70   :  { %2989 = vmatpush3.bf16.msra.mxu1 %v2986_v23  ;;  %v3916_v23 = vpack.c.bf16 %v447_v19, %v444_v16 }
  0x71   :  { %226 = vmatmul.mubr.f32.gmra.mrb[2].mxu0 %v83_v24  ;;  %3022 = vmatprep.subr.bf16.mxu1 %v3729_v40 }
  0x72   :  { %2997 = vmatpush1.bf16.msra.mxu0 %v3853_v25  ;;  %231 = vmatprep.mubr.f32.mxu0 %v3728_v0 }
  0x73   :  { %2999 = vmatprep.subr.bf16.mxu0 %v3856_v26  ;;  %2600 = vmatmul.mubr.f32.vlgmr.msra.gmra.mrb[0].mxu1 %v83_v24  ;;  %v3920_v24 = vpack.c.bf16 %v437_v22, %v434_v21 }
  0x74   :  { %3024 = vmatpush3.bf16.msra.mxu1 %v3866_v41  ;;  %2602 = vmatprep.mubr.f32.mxu1 %v84_v33 }
  0x75   :  { %232 = vmatmul.mubr.f32.gmra.mrb[4].mxu0 %v84_v33  ;;  %3025 = vmatprep.subr.bf16.mxu1 %v3729_v40  ;;  %v140_v33 = vlaneseq }
  0x76   :  { %3001 = vmatpush1.bf16.msra.mxu0 %v3860_v34  ;;  %237 = vmatprep.mubr.f32.mxu0 %v3728_v0 }
  0x77   :  { %3003 = vmatprep.subr.bf16.mxu0 %v3863_v35  ;;  %2603 = vmatmul.mubr.f32.gmra.mrb[2].mxu1 %v85_v44  ;;  %v141_v36 = vshrl.u32 %v140_v33, 7 }
  0x78   :  { %3027 = vmatpush3.bf16.msra.mxu1 %v3876_v51  ;;  %2605 = vmatprep.mubr.f32.mxu1 %v86_v54 }
  0x79   :  { %238 = vmatmul.mubr.f32.gmra.mrb[6].mxu0 %v85_v44  ;;  %3028 = vmatprep.subr.bf16.mxu1 %v3729_v40  ;;  %v3973_v37 = vsub.s32 2, %v141_v36  ;;  %v3989_v58 = vsub.s32 0, %v141_v36 }
  0x7a   :  { %3005 = vmatpush1.bf16.msra.mxu0 %v3870_v45  ;;  %243 = vmatprep.mubr.f32.mxu0 %v3728_v0 }
  0x7b   :  { %3007 = vmatprep.subr.bf16.mxu0 %v3873_v46  ;;  %2606 = vmatmul.mubr.f32.gmra.mrb[4].mxu1 %v87_v1  ;;  %v151_v39 = vrot.slane %v138_v38, %v3973_v37  ;;  %v4001_v5 = vrot.slane %v138_v38, %v3989_v58  ;;  %v455_v6 = vrot.slane %v450_v59, %v3989_v58 }
  0x7c   :  { %3030 = vmatpush3.bf16.msra.mxu1 %v3887_v61  ;;  %2608 = vmatprep.mubr.f32.mxu1 %v88_v3 }
  0x7d   :  { %244 = vmatmul.mubr.f32.gmra.mrb[8].mxu0 %v86_v54  ;;  %3031 = vmatprep.subr.bf16.mxu1 %v3729_v40  ;;  %v3462_v11 = vadd.f32 %v455_v6, %v4001_v5 }
  0x7e   :  { %3009 = vmatpush1.bf16.msra.mxu0 %v3881_v55  ;;  %249 = vmatprep.mubr.f32.mxu0 %v3728_v0 }
  0x7f   :  { %3011 = vmatprep.subr.bf16.mxu0 %v3884_v56  ;;  %2609 = vmatmul.mubr.f32.gmra.mrb[6].mxu1 %v89_v14 }
  0x80   :  { %3033 = vmatpush3.bf16.msra.mxu1 %v3898_v10  ;;  %2643 = vmatprep.mubr.msk.f32.mxu1 %vm3730_vm0, %v3728_v0 }
  0x81   :  { %250 = vmatmul.mubr.f32.gmra.mrb[10].mxu0 %v87_v1  ;;  %3034 = vmatprep.subr.bf16.mxu1 %v3729_v40  ;;  %v3996_v1 = vsub.s32 1, %v141_v36  ;;  %v463_v36 = vrot.slane %v450_v59, %v3973_v37 }
  0x82   :  { %3013 = vmatpush1.bf16.msra.mxu0 %v3892_v2  ;;  %255 = vmatprep.mubr.f32.mxu0 %v3728_v0 }
  0x83   :  { %3015 = vmatprep.subr.bf16.mxu0 %v3895_v4  ;;  %v4005_v7 = vrot.slane %v138_v38, %v3996_v1  ;;  %v459_v8 = vrot.slane %v450_v59, %v3996_v1 }
  0x84   :  { %3036 = vmatpush3.bf16.msra.mxu1 %v3909_v20 }
  0x85   :  { %256 = vmatmul.mubr.f32.gmra.mrb[12].mxu0 %v88_v3  ;;  %3037 = vmatprep.subr.bf16.mxu1 %v3729_v40 }
  0x86   :  { %3017 = vmatpush1.bf16.msra.mxu0 %v3903_v13  ;;  %261 = vmatprep.mubr.f32.mxu0 %v3728_v0 }
  0x87   :  { %3019 = vmatprep.subr.bf16.mxu0 %v3906_v15 }
  0x88   :  { %3039 = vmatpush3.bf16.msra.mxu1 %v3920_v24 }
  0x89   :  { %262 = vmatmul.mubr.f32.gmra.mrb[14].mxu0 %v89_v14  ;;  %3040 = vmatprep.subr.bf16.mxu1 %v3729_v40  ;;  %v3464_v14 = vadd.f32 %v459_v8, %v4005_v7 }
  0x8a   :  { %3021 = vmatpush1.bf16.msra.mxu0 %v3916_v23  ;;  %531 = vmatprep.mubr.f32.mxu0 %v3728_v0 }
  0x8b   :  { %3047 = vmatprep.subr.bf16.mxu0 %v3843_v9 }
  0x8c   :  { %3042 = vmatpush3.bf16.msra.mxu1 %v3927_v29 }
  0x8d   :  { %532 = vmatmul.mubr.f32.vlgmr.msra.gmra.mrb[0].mxu0 %v3728_v0  ;;  %3043 = vmatprep.subr.bf16.mxu1 %v3729_v40 }
  0x8e   :  { %3049 = vmatpush1.bf16.msra.mxu0 %v3845_v17  ;;  %764 = vmatprep.mubr.f32.mxu0 %v3728_v0 }
  0x8f   :  { %3051 = vmatprep.subr.bf16.mxu0 %v3848_v18 }
  0x90   :  { %3045 = vmatpush3.bf16.msra.mxu1 %v3935_v32 }
  0x91   :  { %3078 = vmatprep.subr.bf16.mxu1 %v3729_v40 }
  0x92   :  { %3053 = vmatpush1.bf16.msra.mxu0 %v3853_v25 }
  0x93   :  { %3055 = vmatprep.subr.bf16.mxu0 %v3856_v26  ;;  %2644 = vmatmul.mubr.f32.vlgmr.msra.gmra.mrb[8].mxu1 %v3728_v0 }
  0x94   :  { %3080 = vmatpush3.bf16.msra.mxu1 %v3866_v41  ;;  %2678 = vmatprep.mubr.msk.f32.mxu1 %vm3730_vm0, %v3728_v0 }
  0x95   :  { %3081 = vmatprep.subr.bf16.mxu1 %v3729_v40 }
  0x96   :  { %3057 = vmatpush1.bf16.msra.mxu0 %v3860_v34 }
  0x97   :  { %3059 = vmatprep.subr.bf16.mxu0 %v3863_v35 }
  0x98   :  { %3083 = vmatpush3.bf16.msra.mxu1 %v3876_v51 }
  0x99   :  { %3084 = vmatprep.subr.bf16.mxu1 %v3729_v40 }
  0x9a   :  { %3061 = vmatpush1.bf16.msra.mxu0 %v3870_v45 }
  0x9b   :  { %3063 = vmatprep.subr.bf16.mxu0 %v3873_v46 }
  0x9c   :  { %3086 = vmatpush3.bf16.msra.mxu1 %v3887_v61 }
  0x9d   :  { %3087 = vmatprep.subr.bf16.mxu1 %v3729_v40 }
  0x9e   :  { %3065 = vmatpush1.bf16.msra.mxu0 %v3881_v55 }
  0x9f   :  { %3067 = vmatprep.subr.bf16.mxu0 %v3884_v56 }
  0xa0   :  { %3089 = vmatpush3.bf16.msra.mxu1 %v3898_v10 }
  0xa1   :  { %3090 = vmatprep.subr.bf16.mxu1 %v3729_v40 }
  0xa2   :  { %3069 = vmatpush1.bf16.msra.mxu0 %v3892_v2 }
  0xa3   :  { %3071 = vmatprep.subr.bf16.mxu0 %v3895_v4 }
  0xa4   :  { %3092 = vmatpush3.bf16.msra.mxu1 %v3909_v20 }
  0xa5   :  { %3093 = vmatprep.subr.bf16.mxu1 %v3729_v40 }
  0xa6   :  { %3073 = vmatpush1.bf16.msra.mxu0 %v3903_v13 }
  0xa7   :  { %3075 = vmatprep.subr.bf16.mxu0 %v3906_v15 }
  0xa8   :  { %3095 = vmatpush3.bf16.msra.mxu1 %v3920_v24 }
  0xa9   :  { %3096 = vmatprep.subr.bf16.mxu1 %v3729_v40 }
  0xaa   :  { %3077 = vmatpush1.bf16.msra.mxu0 %v3916_v23 }
  0xab   :  { %3103 = vmatprep.subr.bf16.mxu0 %v3843_v9 }
  0xac   :  { %3098 = vmatpush3.bf16.msra.mxu1 %v3927_v29 }
  0xad   :  { %3099 = vmatprep.subr.bf16.mxu1 %v3729_v40 }
  0xb0   :  { %3101 = vmatpush3.bf16.msra.mxu1 %v3935_v32 }
  0xb1   :  { %3134 = vmatprep.subr.bf16.mxu1 %v3729_v40 }
 0x146   :  { %v2601_v42 = vpop.f32.mrb[0].mxu1 }
 0x147   :  { %v3979_v43 = vadd.f32 %v2601_v42, %v151_v39  ;;  %v334_v44 = vpop.f32.mrb[1].mxu1 }
 0x14a   :  { %v2604_v47 = vpop.f32.mrb[2].mxu1 }
 0x14b   :  { %v3981_v48 = vadd.f32 %v2604_v47, %v151_v39  ;;  %v344_v49 = vpop.f32.mrb[3].mxu1 }
 0x14c   :  { %v3983_v50 = vadd.f32 %v344_v49, %v151_v39 }
 0x14e   :  { %v2607_v52 = vpop.f32.mrb[4].mxu1 }
 0x14f   :  { %v3985_v53 = vadd.f32 %v2607_v52, %v151_v39  ;;  %v354_v54 = vpop.f32.mrb[5].mxu1  ;;  %v335_v52 = vadd.f32 %v334_v44, %v151_v39 }
 0x150   :  { %v3987_v57 = vadd.f32 %v354_v54, %v151_v39 }
 0x152   :  { %v2610_v60 = vpop.f32.mrb[6].mxu1 }
 0x153   :  { %v3994_v62 = vadd.f32 %v2610_v60, %v151_v39  ;;  %v364_v63 = vpop.f32.mrb[7].mxu1 }
 0x154   :  { %v3998_v3 = vadd.f32 %v364_v63, %v151_v39  ;;  %v683_v39 = vld [vmem:[%s4394_s4] sm:$0x7] }
 0x155   :  { %v688_v44 = vrot.slane %v683_v39, %v3989_v58  ;;  %v692_v59 = vrot.slane %v683_v39, %v3996_v1 }
 0x160   :  { %v533_v12 = vpop.f32.mrb[0].mxu0 }
 0x161   :  { %v3463_v16 = vadd.f32 %v3462_v11, %v533_v12  ;;  %v535_v19 = vpop.f32.mrb[1].mxu0 }
 0x162   :  { %v3465_v22 = vadd.f32 %v3464_v14, %v535_v19 }
 0x163   :  { %v2373_v21 = vmul.f32 -1.442695, %v3463_v16  ;;  %v3466_v16 = vadd.f32 %v688_v44, %v4001_v5 }
 0x164   :  { %v2374_v27 = vmul.f32 -1.442695, %v3465_v22  ;;  %v3468_v22 = vadd.f32 %v692_v59, %v4005_v7 }
 0x165   :  { %3522 = vpow2.f32 %v2373_v21 }
 0x166   :  { %v604_v28 = vpop.f32.mrb[8].mxu1  ;;  %3524 = vpow2.f32 %v2374_v27 }
 0x167   :  { %v2645_v30 = vpop.f32.mrb[9].mxu1  ;;  %v605_v47 = vadd.f32 %v604_v28, %v463_v36 }
 0x16f   :  { %v3523_v31 = vpop.eup %3522 }
 0x170   :  { %v612_v33 = vadd.f32 1.0, %v3523_v31  ;;  %v3525_v38 = vpop.eup %3524 }
 0x171   :  { %v619_v42 = vadd.f32 1.0, %v3525_v38 }
 0x172   :  { %3526 = vrcp.f32 %v612_v33 }
 0x173   :  { %3528 = vrcp.f32 %v619_v42 }
 0x17c   :  { %v3527_v49 = vpop.eup %3526 }
 0x17d   :  { %v622_v54 = vmul.f32 %v3527_v49, %v605_v47  ;;  %v3529_v63 = vpop.eup %3528  ;;  %v696_v47 = vrot.slane %v683_v39, %v3973_v37 }
 0x17e   :  { %v625_v6 = vsub.f32 1.0, %v3529_v63  ;;  %v627_v12 = vmul.f32 0.0, %v3529_v63 }
 0x17f   :  { %v623_v60 = vadd.f32 %v622_v54, %v335_v52 }
 0x181   :  { %3530 = vtanh.f32 %v623_v60 }
 0x18b   :  { %v3531_v8 = vpop.eup %3530 }
 0x18c   :  { %v626_v11 = vmul.f32 %v3531_v8, %v625_v6 }
 0x18e   :  { %v4011_v14 = vadd.f32 %v627_v12, %v626_v11 }
 0x190   :  { %765 = vmatmul.mubr.f32.vlgmr.msra.gmra.mrb[2].mxu0 %v4011_v14  ;;  %2679 = vmatmul.mubr.f32.vlgmr.msra.gmra.mrb[10].mxu1 %v4011_v14 }
 0x191   :  { %3105 = vmatpush1.bf16.msra.mxu0 %v3845_v17  ;;  %3136 = vmatpush3.bf16.msra.mxu1 %v3866_v41 }
 0x192   :  { %3107 = vmatprep.subr.bf16.mxu0 %v3848_v18  ;;  %3137 = vmatprep.subr.bf16.mxu1 %v3729_v40 }
 0x193   :  { %997 = vmatprep.mubr.f32.mxu0 %v3728_v0  ;;  %2713 = vmatprep.mubr.msk.f32.mxu1 %vm3730_vm0, %v3728_v0 }
 0x195   :  { %3109 = vmatpush1.bf16.msra.mxu0 %v3853_v25  ;;  %3139 = vmatpush3.bf16.msra.mxu1 %v3876_v51 }
 0x196   :  { %3111 = vmatprep.subr.bf16.mxu0 %v3856_v26  ;;  %3140 = vmatprep.subr.bf16.mxu1 %v3729_v40 }
 0x199   :  { %3113 = vmatpush1.bf16.msra.mxu0 %v3860_v34  ;;  %3142 = vmatpush3.bf16.msra.mxu1 %v3887_v61 }
 0x19a   :  { %3115 = vmatprep.subr.bf16.mxu0 %v3863_v35  ;;  %3143 = vmatprep.subr.bf16.mxu1 %v3729_v40 }
 0x19d   :  { %3117 = vmatpush1.bf16.msra.mxu0 %v3870_v45  ;;  %3145 = vmatpush3.bf16.msra.mxu1 %v3898_v10 }
 0x19e   :  { %3119 = vmatprep.subr.bf16.mxu0 %v3873_v46  ;;  %3146 = vmatprep.subr.bf16.mxu1 %v3729_v40 }
 0x1a1   :  { %3121 = vmatpush1.bf16.msra.mxu0 %v3881_v55  ;;  %3148 = vmatpush3.bf16.msra.mxu1 %v3909_v20 }
 0x1a2   :  { %3123 = vmatprep.subr.bf16.mxu0 %v3884_v56  ;;  %3149 = vmatprep.subr.bf16.mxu1 %v3729_v40 }
 0x1a5   :  { %3125 = vmatpush1.bf16.msra.mxu0 %v3892_v2  ;;  %3151 = vmatpush3.bf16.msra.mxu1 %v3920_v24 }
 0x1a6   :  { %3127 = vmatprep.subr.bf16.mxu0 %v3895_v4  ;;  %3152 = vmatprep.subr.bf16.mxu1 %v3729_v40 }
 0x1a9   :  { %3129 = vmatpush1.bf16.msra.mxu0 %v3903_v13  ;;  %3154 = vmatpush3.bf16.msra.mxu1 %v3927_v29 }
 0x1aa   :  { %3131 = vmatprep.subr.bf16.mxu0 %v3906_v15  ;;  %3155 = vmatprep.subr.bf16.mxu1 %v3729_v40 }
 0x1ad   :  { %3133 = vmatpush1.bf16.msra.mxu0 %v3916_v23  ;;  %3157 = vmatpush3.bf16.msra.mxu1 %v3935_v32 }
 0x1ae   :  { %3159 = vmatprep.subr.bf16.mxu0 %v3843_v9  ;;  %3190 = vmatprep.subr.bf16.mxu1 %v3729_v40 }
 0x263   :  { %v766_v19 = vpop.f32.mrb[2].mxu0  ;;  %v837_v21 = vpop.f32.mrb[10].mxu1 }
 0x264   :  { %v3467_v27 = vadd.f32 %v3466_v16, %v766_v19  ;;  %v768_v28 = vpop.f32.mrb[3].mxu0  ;;  %v2680_v30 = vpop.f32.mrb[11].mxu1  ;;  %v838_v52 = vadd.f32 %v837_v21, %v696_v47  ;;  %v1335_v21 = vld [vmem:[#allocation9 + $0x8] sm:$0xff]  ;;  %v1340_v47 = vld [vmem:[#allocation9 + $0x30] sm:$0xff] }
 0x265   :  { %v3469_v31 = vadd.f32 %v3468_v22, %v768_v28  ;;  %v1337_v28 = vld [vmem:[#allocation9 + $0x18] sm:$0xff]  ;;  %v1336_v30 = vld [vmem:[#allocation9 + $0x10] sm:$0xff] }
 0x266   :  { %v2375_v9 = vmul.f32 -1.442695, %v3467_v27  ;;  %v1334_v27 = vld [vmem:[#allocation9] sm:$0xff] }
 0x267   :  { %v2376_v33 = vmul.f32 -1.442695, %v3469_v31  ;;  %v1339_v31 = vld [vmem:[#allocation9 + $0x28] sm:$0xff] }
 0x268   :  { %3532 = vpow2.f32 %v2375_v9  ;;  %v4117_v9 = vpack.c.bf16 %v1337_v28, %v1334_v27  ;;  %v1371_v28 = vld [vmem:[#allocation9 + $0x128] sm:$0xff] }
 0x269   :  { %3534 = vpow2.f32 %v2376_v33  ;;  %v4120_v33 = vpack.c.bf16 %v1339_v31, %v1336_v30  ;;  %v1374_v30 = vld [vmem:[#allocation9 + $0x140] sm:$0xff] }
 0x26a   :  { %v1370_v31 = vld [vmem:[#allocation9 + $0x120] sm:$0xff] }
 0x272   :  { %v3533_v36 = vpop.eup %3532 }
 0x273   :  { %v845_v38 = vadd.f32 1.0, %v3533_v36  ;;  %v3535_v42 = vpop.eup %3534  ;;  %v1341_v36 = vld [vmem:[#allocation9 + $0x38] sm:$0xff] }
 0x274   :  { %v852_v49 = vadd.f32 1.0, %v3535_v42 }
 0x275   :  { %3536 = vrcp.f32 %v845_v38  ;;  %v1344_v38 = vld [vmem:[#allocation9 + $0x50] sm:$0xff] }
 0x276   :  { %3538 = vrcp.f32 %v852_v49  ;;  %v4124_v42 = vpack.c.bf16 %v1344_v38, %v1341_v36  ;;  %v1343_v49 = vld [vmem:[#allocation9 + $0x48] sm:$0xff]  ;;  %v4172_v36 = vpack.c.bf16 %v1374_v30, %v1371_v28  ;;  %v1373_v38 = vld [vmem:[#allocation9 + $0x138] sm:$0xff] }
 0x27f   :  { %v3537_v54 = vpop.eup %3536 }
 0x280   :  { %v855_v60 = vmul.f32 %v3537_v54, %v838_v52  ;;  %v3539_v6 = vpop.eup %3538  ;;  %v1342_v52 = vld [vmem:[#allocation9 + $0x40] sm:$0xff]  ;;  %v4127_v54 = vpack.c.bf16 %v1343_v49, %v1340_v47  ;;  %v1372_v47 = vld [vmem:[#allocation9 + $0x130] sm:$0xff]  ;;  %v1375_v49 = vld [vmem:[#allocation9 + $0x148] sm:$0xff] }
 0x281   :  { %v858_v8 = vsub.f32 1.0, %v3539_v6  ;;  %v860_v44 = vmul.f32 %v3539_v6, %v4011_v14  ;;  %v1347_v6 = vld [vmem:[#allocation9 + $0x68] sm:$0xff] }
 0x282   :  { %v856_v63 = vadd.f32 %v855_v60, %v3979_v43  ;;  %v1345_v60 = vld [vmem:[#allocation9 + $0x58] sm:$0xff] }
 0x284   :  { %3540 = vtanh.f32 %v856_v63  ;;  %v4130_v63 = vpack.c.bf16 %v1345_v60, %v1342_v52  ;;  %v4175_v52 = vpack.c.bf16 %v1373_v38, %v1370_v31  ;;  %v1377_v60 = vld [vmem:[#allocation9 + $0x158] sm:$0xff] }
 0x28e   :  { %v3541_v11 = vpop.eup %3540 }
 0x28f   :  { %v859_v12 = vmul.f32 %v3541_v11, %v858_v8  ;;  %v1350_v8 = vld [vmem:[#allocation9 + $0x80] sm:$0xff] }
 0x290   :  { %v4134_v11 = vpack.c.bf16 %v1350_v8, %v1347_v6  ;;  %v1380_v6 = vld [vmem:[#allocation9 + $0x170] sm:$0xff]  ;;  %v4179_v8 = vpack.c.bf16 %v1375_v49, %v1372_v47 }
 0x291   :  { %v4060_v59 = vadd.f32 %v860_v44, %v859_v12  ;;  %v1346_v12 = vld [vmem:[#allocation9 + $0x60] sm:$0xff]  ;;  %v1349_v44 = vld [vmem:[#allocation9 + $0x78] sm:$0xff] }
 0x293   :  { %998 = vmatmul.mubr.f32.vlgmr.msra.gmra.mrb[4].mxu0 %v4060_v59  ;;  %2714 = vmatmul.mubr.f32.vlgmr.msra.gmra.mrb[12].mxu1 %v4060_v59 }
 0x294   :  { %3161 = vmatpush1.bf16.msra.mxu0 %v3845_v17  ;;  %3192 = vmatpush3.bf16.msra.mxu1 %v3866_v41  ;;  %v916_v17 = vld [vmem:[%s4394_s4] sm:$0x7] }
 0x295   :  { %3163 = vmatprep.subr.bf16.mxu0 %v3848_v18  ;;  %3193 = vmatprep.subr.bf16.mxu1 %v3729_v40  ;;  %v921_v18 = vrot.slane %v916_v17, %v3989_v58 }
 0x296   :  { %1230 = vmatprep.mubr.f32.mxu0 %v3728_v0  ;;  %2748 = vmatprep.mubr.msk.f32.mxu1 %vm3730_vm0, %v3728_v0 }
 0x298   :  { %3165 = vmatpush1.bf16.msra.mxu0 %v3853_v25  ;;  %3195 = vmatpush3.bf16.msra.mxu1 %v3876_v51  ;;  %v925_v25 = vrot.slane %v916_v17, %v3996_v1 }
 0x299   :  { %3167 = vmatprep.subr.bf16.mxu0 %v3856_v26  ;;  %3196 = vmatprep.subr.bf16.mxu1 %v3729_v40  ;;  %v3470_v26 = vadd.f32 %v921_v18, %v4001_v5  ;;  %v1351_v18 = vld [vmem:[#allocation9 + $0x88] sm:$0xff] }
 0x29a   :  { %v3472_v41 = vadd.f32 %v925_v25, %v4005_v7 }
 0x29c   :  { %3169 = vmatpush1.bf16.msra.mxu0 %v3860_v34  ;;  %3198 = vmatpush3.bf16.msra.mxu1 %v3887_v61 }
 0x29d   :  { %3171 = vmatprep.subr.bf16.mxu0 %v3863_v35  ;;  %3199 = vmatprep.subr.bf16.mxu1 %v3729_v40 }
 0x2a0   :  { %3173 = vmatpush1.bf16.msra.mxu0 %v3870_v45  ;;  %3201 = vmatpush3.bf16.msra.mxu1 %v3898_v10 }
 0x2a1   :  { %3175 = vmatprep.subr.bf16.mxu0 %v3873_v46  ;;  %3202 = vmatprep.subr.bf16.mxu1 %v3729_v40 }
 0x2a4   :  { %3177 = vmatpush1.bf16.msra.mxu0 %v3881_v55  ;;  %3204 = vmatpush3.bf16.msra.mxu1 %v3909_v20 }
 0x2a5   :  { %3179 = vmatprep.subr.bf16.mxu0 %v3884_v56  ;;  %3205 = vmatprep.subr.bf16.mxu1 %v3729_v40 }
 0x2a8   :  { %3181 = vmatpush1.bf16.msra.mxu0 %v3892_v2  ;;  %3207 = vmatpush3.bf16.msra.mxu1 %v3920_v24 }
 0x2a9   :  { %3183 = vmatprep.subr.bf16.mxu0 %v3895_v4  ;;  %3208 = vmatprep.subr.bf16.mxu1 %v3729_v40 }
 0x2ac   :  { %3185 = vmatpush1.bf16.msra.mxu0 %v3903_v13  ;;  %3210 = vmatpush3.bf16.msra.mxu1 %v3927_v29  ;;  %v929_v13 = vrot.slane %v916_v17, %v3973_v37  ;;  %v4137_v17 = vpack.c.bf16 %v1349_v44, %v1346_v12  ;;  %v4181_v12 = vpack.c.bf16 %v1380_v6, %v1377_v60  ;;  %v1376_v44 = vld [vmem:[#allocation9 + $0x150] sm:$0xff] }
 0x2ad   :  { %3187 = vmatprep.subr.bf16.mxu0 %v3906_v15  ;;  %3211 = vmatprep.subr.bf16.mxu1 %v3729_v40 }
 0x2b0   :  { %3189 = vmatpush1.bf16.msra.mxu0 %v3916_v23  ;;  %3213 = vmatpush3.bf16.msra.mxu1 %v3935_v32 }
 0x2b1   :  { %3246 = vmatprep.subr.bf16.mxu1 %v3729_v40 }
 0x366   :  { %v999_v34 = vpop.f32.mrb[4].mxu0  ;;  %v1070_v35 = vpop.f32.mrb[12].mxu1 }
 0x367   :  { %v3471_v45 = vadd.f32 %v3470_v26, %v999_v34  ;;  %v1001_v46 = vpop.f32.mrb[5].mxu0  ;;  %v2715_v51 = vpop.f32.mrb[13].mxu1  ;;  %v1071_v20 = vadd.f32 %v1070_v35, %v929_v13  ;;  %v1353_v26 = vld [vmem:[#allocation9 + $0x98] sm:$0xff]  ;;  %v1356_v34 = vld [vmem:[#allocation9 + $0xb0] sm:$0xff] }
 0x368   :  { %v3473_v56 = vadd.f32 %v3472_v41, %v1001_v46  ;;  %v4144_v35 = vpack.c.bf16 %v1356_v34, %v1353_v26  ;;  %v1352_v41 = vld [vmem:[#allocation9 + $0x90] sm:$0xff]  ;;  %v1354_v46 = vld [vmem:[#allocation9 + $0xa0] sm:$0xff]  ;;  %v1361_v13 = vld [vmem:[#allocation9 + $0xd8] sm:$0xff] }
 0x369   :  { %v2377_v55 = vmul.f32 -1.442695, %v3471_v45  ;;  %v1355_v45 = vld [vmem:[#allocation9 + $0xa8] sm:$0xff]  ;;  %v1381_v26 = vld [vmem:[#allocation9 + $0x178] sm:$0xff] }
 0x36a   :  { %v2378_v61 = vmul.f32 -1.442695, %v3473_v56  ;;  %v4147_v51 = vpack.c.bf16 %v1355_v45, %v1352_v41  ;;  %v1149_v45 = vld [vmem:[%s4394_s4] sm:$0x7] }
 0x36b   :  { %3542 = vpow2.f32 %v2377_v55  ;;  %v1357_v55 = vld [vmem:[#allocation9 + $0xb8] sm:$0xff]  ;;  %v1162_v30 = vrot.slane %v1149_v45, %v3973_v37 }
 0x36c   :  { %3544 = vpow2.f32 %v2378_v61  ;;  %v4150_v56 = vpack.c.bf16 %v1357_v55, %v1354_v46  ;;  %v1359_v61 = vld [vmem:[#allocation9 + $0xc8] sm:$0xff]  ;;  %v1154_v46 = vrot.slane %v1149_v45, %v3989_v58  ;;  %v1158_v55 = vrot.slane %v1149_v45, %v3996_v1 }
 0x375   :  { %v3543_v2 = vpop.eup %3542 }
 0x376   :  { %v1078_v4 = vadd.f32 1.0, %v3543_v2  ;;  %v3545_v10 = vpop.eup %3544  ;;  %v1362_v2 = vld [vmem:[#allocation9 + $0xe0] sm:$0xff] }
 0x377   :  { %v1085_v15 = vadd.f32 1.0, %v3545_v10  ;;  %v1358_v10 = vld [vmem:[#allocation9 + $0xc0] sm:$0xff] }
 0x378   :  { %3546 = vrcp.f32 %v1078_v4  ;;  %v4154_v4 = vpack.c.bf16 %v1362_v2, %v1359_v61  ;;  %v3474_v61 = vadd.f32 %v1154_v46, %v4001_v5 }
 0x379   :  { %3548 = vrcp.f32 %v1085_v15  ;;  %v1360_v15 = vld [vmem:[#allocation9 + $0xd0] sm:$0xff] }
 0x382   :  { %v3547_v23 = vpop.eup %3546 }
 0x383   :  { %v1088_v24 = vmul.f32 %v3547_v23, %v1071_v20  ;;  %v3549_v32 = vpop.eup %3548  ;;  %v4157_v20 = vpack.c.bf16 %v1361_v13, %v1358_v10  ;;  %v1363_v23 = vld [vmem:[#allocation9 + $0xe8] sm:$0xff]  ;;  %v3476_v13 = vadd.f32 %v1158_v55, %v4005_v7 }
 0x384   :  { %v1091_v43 = vsub.f32 1.0, %v3549_v32  ;;  %v1093_v16 = vmul.f32 %v3549_v32, %v4060_v59  ;;  %v1348_v59 = vld [vmem:[#allocation9 + $0x70] sm:$0xff] }
 0x385   :  { %v1089_v29 = vadd.f32 %v1088_v24, %v3983_v50  ;;  %v1338_v50 = vld [vmem:[#allocation9 + $0x20] sm:$0xff]  ;;  %v4140_v25 = vpack.c.bf16 %v1351_v18, %v1348_v59  ;;  %v4160_v24 = vpack.c.bf16 %v1363_v23, %v1360_v15  ;;  %v1368_v32 = vld [vmem:[#allocation9 + $0x110] sm:$0xff]  ;;  %v1379_v59 = vld [vmem:[#allocation9 + $0x168] sm:$0xff] }
 0x386   :  { %v4115_v22 = vpack.c.bf16 %v1338_v50, %v1335_v21  ;;  %v1369_v21 = vld [vmem:[#allocation9 + $0x118] sm:$0xff]  ;;  %v1378_v18 = vld [vmem:[#allocation9 + $0x160] sm:$0xff]  ;;  %v4185_v34 = vpack.c.bf16 %v1379_v59, %v1376_v44 }
 0x387   :  { %3550 = vtanh.f32 %v1089_v29  ;;  %v1365_v29 = vld [vmem:[#allocation9 + $0xf8] sm:$0xff]  ;;  %v4189_v41 = vpack.c.bf16 %v1381_v26, %v1378_v18 }
 0x388   :  { %3215 = vmatprep.subr.bf16.mxu0 %v4115_v22 }
 0x391   :  { %v3551_v14 = vpop.eup %3550 }
 0x392   :  { %v1092_v39 = vmul.f32 %v3551_v14, %v1091_v43  ;;  %v1364_v43 = vld [vmem:[#allocation9 + $0xf0] sm:$0xff]  ;;  %v4164_v14 = vpack.c.bf16 %v1368_v32, %v1365_v29 }
 0x394   :  { %v4108_v19 = vadd.f32 %v1093_v16, %v1092_v39  ;;  %v1367_v39 = vld [vmem:[#allocation9 + $0x108] sm:$0xff]  ;;  %v1366_v16 = vld [vmem:[#allocation9 + $0x100] sm:$0xff] }
 0x395   :  { %v4167_v50 = vpack.c.bf16 %v1367_v39, %v1364_v43  ;;  %v4169_v27 = vpack.c.bf16 %v1369_v21, %v1366_v16 }
 0x396   :  { %1231 = vmatmul.mubr.f32.vlgmr.msra.gmra.mrb[6].mxu0 %v4108_v19  ;;  %2749 = vmatmul.mubr.f32.vlgmr.msra.gmra.mrb[14].mxu1 %v4108_v19 }
 0x397   :  { %1463 = vmatprep.mubr.f32.mxu0 %v3728_v0  ;;  %2783 = vmatprep.mubr.msk.f32.mxu1 %vm3730_vm0, %v3728_v0 }
 0x398   :  { %3217 = vmatpush1.bf16.msra.mxu0 %v4117_v9  ;;  %3248 = vmatpush3.bf16.msra.mxu1 %v4120_v33 }
 0x399   :  { %3249 = vmatprep.subr.bf16.mxu1 %v3729_v40  ;;  %3219 = vmatprep.subr.bf16.mxu0 %v4124_v42 }
 0x39c   :  { %3221 = vmatpush1.bf16.msra.mxu0 %v4127_v54  ;;  %3251 = vmatpush3.bf16.msra.mxu1 %v4130_v63 }
 0x39d   :  { %3252 = vmatprep.subr.bf16.mxu1 %v3729_v40  ;;  %3223 = vmatprep.subr.bf16.mxu0 %v4134_v11 }
 0x3a0   :  { %3225 = vmatpush1.bf16.msra.mxu0 %v4137_v17  ;;  %3254 = vmatpush3.bf16.msra.mxu1 %v4140_v25 }
 0x3a1   :  { %3255 = vmatprep.subr.bf16.mxu1 %v3729_v40  ;;  %3227 = vmatprep.subr.bf16.mxu0 %v4144_v35 }
 0x3a4   :  { %3229 = vmatpush1.bf16.msra.mxu0 %v4147_v51  ;;  %3257 = vmatpush3.bf16.msra.mxu1 %v4150_v56 }
 0x3a5   :  { %3258 = vmatprep.subr.bf16.mxu1 %v3729_v40  ;;  %3231 = vmatprep.subr.bf16.mxu0 %v4154_v4 }
 0x3a8   :  { %3233 = vmatpush1.bf16.msra.mxu0 %v4157_v20  ;;  %3260 = vmatpush3.bf16.msra.mxu1 %v4160_v24 }
 0x3a9   :  { %3261 = vmatprep.subr.bf16.mxu1 %v3729_v40  ;;  %3235 = vmatprep.subr.bf16.mxu0 %v4164_v14 }
 0x3ac   :  { %3237 = vmatpush1.bf16.msra.mxu0 %v4167_v50  ;;  %3263 = vmatpush3.bf16.msra.mxu1 %v4169_v27 }
 0x3ad   :  { %3239 = vmatprep.subr.bf16.mxu0 %v4172_v36  ;;  %3264 = vmatprep.subr.bf16.mxu1 %v3729_v40 }
 0x3b0   :  { %3241 = vmatpush1.bf16.msra.mxu0 %v4175_v52  ;;  %3266 = vmatpush3.bf16.msra.mxu1 %v4179_v8 }
 0x3b1   :  { %3243 = vmatprep.subr.bf16.mxu0 %v4181_v12  ;;  %3267 = vmatprep.subr.bf16.mxu1 %v3729_v40 }
 0x3b4   :  { %3245 = vmatpush1.bf16.msra.mxu0 %v4185_v34  ;;  %3269 = vmatpush3.bf16.msra.mxu1 %v4189_v41 }
 0x3b5   :  { %3271 = vmatprep.subr.bf16.mxu0 %v4115_v22  ;;  %3302 = vmatprep.subr.bf16.mxu1 %v3729_v40 }
 0x469   :  { %v1232_v2 = vpop.f32.mrb[6].mxu0  ;;  %v1303_v10 = vpop.f32.mrb[14].mxu1 }
 0x46a   :  { %v3475_v15 = vadd.f32 %v3474_v61, %v1232_v2  ;;  %v1234_v23 = vpop.f32.mrb[7].mxu0  ;;  %v2750_v29 = vpop.f32.mrb[15].mxu1  ;;  %v1304_v38 = vadd.f32 %v1303_v10, %v1162_v30 }
 0x46b   :  { %v3477_v43 = vadd.f32 %v3476_v13, %v1234_v23 }
 0x46c   :  { %v2379_v32 = vmul.f32 -1.442695, %v3475_v15 }
 0x46d   :  { %v2380_v39 = vmul.f32 -1.442695, %v3477_v43 }
 0x46e   :  { %3552 = vpow2.f32 %v2379_v32 }
 0x46f   :  { %3554 = vpow2.f32 %v2380_v39 }
 0x478   :  { %v3553_v16 = vpop.eup %3552 }
 0x479   :  { %v1311_v21 = vadd.f32 1.0, %v3553_v16  ;;  %v3555_v28 = vpop.eup %3554 }
 0x47a   :  { %v1318_v31 = vadd.f32 1.0, %v3555_v28 }
 0x47b   :  { %3556 = vrcp.f32 %v1311_v21 }
 0x47c   :  { %3558 = vrcp.f32 %v1318_v31 }
 0x485   :  { %v3557_v47 = vpop.eup %3556 }
 0x486   :  { %v1321_v49 = vmul.f32 %v3557_v47, %v1304_v38  ;;  %v3559_v6 = vpop.eup %3558 }
 0x487   :  { %v1324_v44 = vsub.f32 1.0, %v3559_v6  ;;  %v1326_v26 = vmul.f32 %v3559_v6, %v4108_v19 }
 0x488   :  { %v1322_v60 = vadd.f32 %v1321_v49, %v3981_v48  ;;  %v1382_v48 = vld [vmem:[%s4394_s4] sm:$0x7] }
 0x489   :  { %v1387_v19 = vrot.slane %v1382_v48, %v3989_v58  ;;  %v1391_v45 = vrot.slane %v1382_v48, %v3996_v1  ;;  %v1395_v28 = vrot.slane %v1382_v48, %v3973_v37 }
 0x48a   :  { %3560 = vtanh.f32 %v1322_v60 }
 0x48b   :  { %v3478_v55 = vadd.f32 %v1387_v19, %v4001_v5  ;;  %v3480_v10 = vadd.f32 %v1391_v45, %v4005_v7 }
 0x494   :  { %v3561_v59 = vpop.eup %3560 }
 0x495   :  { %v1325_v18 = vmul.f32 %v3561_v59, %v1324_v44 }
 0x497   :  { %v4206_v46 = vadd.f32 %v1326_v26, %v1325_v18 }
 0x499   :  { %1464 = vmatmul.mubr.f32.vlgmr.msra.gmra.mrb[8].mxu0 %v4206_v46  ;;  %2784 = vmatmul.mubr.f32.vlgmr.msra.gmra.mrb[16].mxu1 %v4206_v46 }
 0x49a   :  { %3273 = vmatpush1.bf16.msra.mxu0 %v4117_v9  ;;  %3304 = vmatpush3.bf16.msra.mxu1 %v4120_v33 }
 0x49b   :  { %3275 = vmatprep.subr.bf16.mxu0 %v4124_v42  ;;  %3305 = vmatprep.subr.bf16.mxu1 %v3729_v40 }
 0x49c   :  { %1696 = vmatprep.mubr.f32.mxu0 %v3728_v0  ;;  %2818 = vmatprep.mubr.msk.f32.mxu1 %vm3730_vm0, %v3728_v0 }
 0x49e   :  { %3277 = vmatpush1.bf16.msra.mxu0 %v4127_v54  ;;  %3307 = vmatpush3.bf16.msra.mxu1 %v4130_v63 }
 0x49f   :  { %3279 = vmatprep.subr.bf16.mxu0 %v4134_v11  ;;  %3308 = vmatprep.subr.bf16.mxu1 %v3729_v40 }
 0x4a2   :  { %3281 = vmatpush1.bf16.msra.mxu0 %v4137_v17  ;;  %3310 = vmatpush3.bf16.msra.mxu1 %v4140_v25 }
 0x4a3   :  { %3283 = vmatprep.subr.bf16.mxu0 %v4144_v35  ;;  %3311 = vmatprep.subr.bf16.mxu1 %v3729_v40 }
 0x4a6   :  { %3285 = vmatpush1.bf16.msra.mxu0 %v4147_v51  ;;  %3313 = vmatpush3.bf16.msra.mxu1 %v4150_v56 }
 0x4a7   :  { %3287 = vmatprep.subr.bf16.mxu0 %v4154_v4  ;;  %3314 = vmatprep.subr.bf16.mxu1 %v3729_v40 }
 0x4aa   :  { %3289 = vmatpush1.bf16.msra.mxu0 %v4157_v20  ;;  %3316 = vmatpush3.bf16.msra.mxu1 %v4160_v24 }
 0x4ab   :  { %3291 = vmatprep.subr.bf16.mxu0 %v4164_v14  ;;  %3317 = vmatprep.subr.bf16.mxu1 %v3729_v40 }
 0x4ae   :  { %3293 = vmatpush1.bf16.msra.mxu0 %v4167_v50  ;;  %3319 = vmatpush3.bf16.msra.mxu1 %v4169_v27 }
 0x4af   :  { %3295 = vmatprep.subr.bf16.mxu0 %v4172_v36  ;;  %3320 = vmatprep.subr.bf16.mxu1 %v3729_v40 }
 0x4b2   :  { %3297 = vmatpush1.bf16.msra.mxu0 %v4175_v52  ;;  %3322 = vmatpush3.bf16.msra.mxu1 %v4179_v8 }
 0x4b3   :  { %3299 = vmatprep.subr.bf16.mxu0 %v4181_v12  ;;  %3323 = vmatprep.subr.bf16.mxu1 %v3729_v40 }
 0x4b6   :  { %3301 = vmatpush1.bf16.msra.mxu0 %v4185_v34  ;;  %3325 = vmatpush3.bf16.msra.mxu1 %v4189_v41 }
 0x4b7   :  { %3327 = vmatprep.subr.bf16.mxu0 %v4115_v22  ;;  %3358 = vmatprep.subr.bf16.mxu1 %v3729_v40 }
 0x56c   :  { %v1465_v61 = vpop.f32.mrb[8].mxu0  ;;  %v1536_v2 = vpop.f32.mrb[16].mxu1 }
 0x56d   :  { %v3479_v13 = vadd.f32 %v3478_v55, %v1465_v61  ;;  %v1467_v15 = vpop.f32.mrb[9].mxu0  ;;  %v2785_v23 = vpop.f32.mrb[17].mxu1  ;;  %v1537_v31 = vadd.f32 %v1536_v2, %v1395_v28 }
 0x56e   :  { %v3481_v32 = vadd.f32 %v3480_v10, %v1467_v15 }
 0x56f   :  { %v2381_v29 = vmul.f32 -1.442695, %v3479_v13 }
 0x570   :  { %v2382_v43 = vmul.f32 -1.442695, %v3481_v32 }
 0x571   :  { %3562 = vpow2.f32 %v2381_v29 }
 0x572   :  { %3564 = vpow2.f32 %v2382_v43 }
 0x57b   :  { %v3563_v39 = vpop.eup %3562 }
 0x57c   :  { %v1544_v16 = vadd.f32 1.0, %v3563_v39  ;;  %v3565_v21 = vpop.eup %3564 }
 0x57d   :  { %v1551_v30 = vadd.f32 1.0, %v3565_v21 }
 0x57e   :  { %3566 = vrcp.f32 %v1544_v16 }
 0x57f   :  { %3568 = vrcp.f32 %v1551_v30 }
 0x588   :  { %v3567_v38 = vpop.eup %3566 }
 0x589   :  { %v1554_v47 = vmul.f32 %v3567_v38, %v1537_v31  ;;  %v3569_v60 = vpop.eup %3568 }
 0x58a   :  { %v1557_v6 = vsub.f32 1.0, %v3569_v60  ;;  %v1559_v18 = vmul.f32 %v3569_v60, %v4206_v46 }
 0x58b   :  { %v1555_v49 = vadd.f32 %v1554_v47, %v3987_v57  ;;  %v1615_v57 = vld [vmem:[%s4394_s4] sm:$0x7] }
 0x58c   :  { %v1620_v46 = vrot.slane %v1615_v57, %v3989_v58  ;;  %v1624_v48 = vrot.slane %v1615_v57, %v3996_v1  ;;  %v1628_v39 = vrot.slane %v1615_v57, %v3973_v37 }
 0x58d   :  { %3570 = vtanh.f32 %v1555_v49 }
 0x58e   :  { %v3482_v19 = vadd.f32 %v1620_v46, %v4001_v5  ;;  %v3484_v61 = vadd.f32 %v1624_v48, %v4005_v7  ;;  %v2262_v46 = vld [vmem:[#allocation10] sm:$0xff]  ;;  %v2263_v48 = vld [vmem:[#allocation10 + $0x8] sm:$0xff] }
 0x597   :  { %v3571_v44 = vpop.eup %3570 }
 0x598   :  { %v1558_v59 = vmul.f32 %v3571_v44, %v1557_v6 }
 0x59a   :  { %v4255_v26 = vadd.f32 %v1559_v18, %v1558_v59 }
 0x59c   :  { %1697 = vmatmul.mubr.f32.vlgmr.msra.gmra.mrb[10].mxu0 %v4255_v26  ;;  %2819 = vmatmul.mubr.f32.vlgmr.msra.gmra.mrb[18].mxu1 %v4255_v26 }
 0x59d   :  { %3329 = vmatpush1.bf16.msra.mxu0 %v4117_v9  ;;  %3360 = vmatpush3.bf16.msra.mxu1 %v4120_v33 }
 0x59e   :  { %3331 = vmatprep.subr.bf16.mxu0 %v4124_v42  ;;  %3361 = vmatprep.subr.bf16.mxu1 %v3729_v40 }
 0x59f   :  { %1929 = vmatprep.mubr.f32.mxu0 %v3728_v0  ;;  %2853 = vmatprep.mubr.msk.f32.mxu1 %vm3730_vm0, %v3728_v0 }
 0x5a1   :  { %3333 = vmatpush1.bf16.msra.mxu0 %v4127_v54  ;;  %3363 = vmatpush3.bf16.msra.mxu1 %v4130_v63 }
 0x5a2   :  { %3335 = vmatprep.subr.bf16.mxu0 %v4134_v11  ;;  %3364 = vmatprep.subr.bf16.mxu1 %v3729_v40 }
 0x5a5   :  { %3337 = vmatpush1.bf16.msra.mxu0 %v4137_v17  ;;  %3366 = vmatpush3.bf16.msra.mxu1 %v4140_v25 }
 0x5a6   :  { %3339 = vmatprep.subr.bf16.mxu0 %v4144_v35  ;;  %3367 = vmatprep.subr.bf16.mxu1 %v3729_v40 }
 0x5a9   :  { %3341 = vmatpush1.bf16.msra.mxu0 %v4147_v51  ;;  %3369 = vmatpush3.bf16.msra.mxu1 %v4150_v56 }
 0x5aa   :  { %3343 = vmatprep.subr.bf16.mxu0 %v4154_v4  ;;  %3370 = vmatprep.subr.bf16.mxu1 %v3729_v40 }
 0x5ad   :  { %3345 = vmatpush1.bf16.msra.mxu0 %v4157_v20  ;;  %3372 = vmatpush3.bf16.msra.mxu1 %v4160_v24 }
 0x5ae   :  { %3347 = vmatprep.subr.bf16.mxu0 %v4164_v14  ;;  %3373 = vmatprep.subr.bf16.mxu1 %v3729_v40 }
 0x5b1   :  { %3349 = vmatpush1.bf16.msra.mxu0 %v4167_v50  ;;  %3375 = vmatpush3.bf16.msra.mxu1 %v4169_v27 }
 0x5b2   :  { %3351 = vmatprep.subr.bf16.mxu0 %v4172_v36  ;;  %3376 = vmatprep.subr.bf16.mxu1 %v3729_v40 }
 0x5b5   :  { %3353 = vmatpush1.bf16.msra.mxu0 %v4175_v52  ;;  %3378 = vmatpush3.bf16.msra.mxu1 %v4179_v8 }
 0x5b6   :  { %3355 = vmatprep.subr.bf16.mxu0 %v4181_v12  ;;  %3379 = vmatprep.subr.bf16.mxu1 %v3729_v40 }
 0x5b9   :  { %3357 = vmatpush1.bf16.msra.mxu0 %v4185_v34  ;;  %3381 = vmatpush3.bf16.msra.mxu1 %v4189_v41 }
 0x5ba   :  { %3383 = vmatprep.subr.bf16.mxu0 %v4115_v22  ;;  %3414 = vmatprep.subr.bf16.mxu1 %v3729_v40 }
 0x66f   :  { %v1698_v45 = vpop.f32.mrb[10].mxu0  ;;  %v1769_v55 = vpop.f32.mrb[18].mxu1 }
 0x670   :  { %v3483_v2 = vadd.f32 %v3482_v19, %v1698_v45  ;;  %v1700_v10 = vpop.f32.mrb[11].mxu0  ;;  %v2820_v13 = vpop.f32.mrb[19].mxu1  ;;  %v1770_v21 = vadd.f32 %v1769_v55, %v1628_v39  ;;  %v3439_v19 = vpack.c.bf16 %v2263_v48, %v2262_v46  ;;  %v2265_v45 = vld [vmem:[#allocation10 + $0x18] sm:$0xff] }
 0x671   :  { %v3485_v15 = vadd.f32 %v3484_v61, %v1700_v10  ;;  %v2266_v61 = vld [vmem:[#allocation10 + $0x20] sm:$0xff]  ;;  %v2268_v13 = vld [vmem:[#allocation10 + $0x30] sm:$0xff] }
 0x672   :  { %v2383_v22 = vmul.f32 -1.442695, %v3483_v2  ;;  %v2267_v2 = vld [vmem:[#allocation10 + $0x28] sm:$0xff] }
 0x673   :  { %v2384_v23 = vmul.f32 -1.442695, %v3485_v15  ;;  %v3445_v10 = vpack.c.bf16 %v2267_v2, %v2266_v61  ;;  %v2270_v15 = vld [vmem:[#allocation10 + $0x40] sm:$0xff] }
 0x674   :  { %3572 = vpow2.f32 %v2383_v22 }
 0x675   :  { %3574 = vpow2.f32 %v2384_v23  ;;  %v2271_v23 = vld [vmem:[#allocation10 + $0x48] sm:$0xff] }
 0x67e   :  { %v3573_v29 = vpop.eup %3572 }
 0x67f   :  { %v1777_v32 = vadd.f32 1.0, %v3573_v29  ;;  %v3575_v43 = vpop.eup %3574  ;;  %v3451_v29 = vpack.c.bf16 %v2271_v23, %v2270_v15 }
 0x680   :  { %v1784_v16 = vadd.f32 1.0, %v3575_v43  ;;  %v2273_v43 = vld [vmem:[#allocation10 + $0x58] sm:$0xff] }
 0x681   :  { %3576 = vrcp.f32 %v1777_v32  ;;  %v2272_v32 = vld [vmem:[#allocation10 + $0x50] sm:$0xff] }
 0x682   :  { %3578 = vrcp.f32 %v1784_v16  ;;  %v3454_v39 = vpack.c.bf16 %v2273_v43, %v2272_v32  ;;  %v2274_v16 = vld [vmem:[#allocation10 + $0x60] sm:$0xff] }
 0x68b   :  { %v3577_v28 = vpop.eup %3576 }
 0x68c   :  { %v1787_v30 = vmul.f32 %v3577_v28, %v1770_v21  ;;  %v3579_v38 = vpop.eup %3578  ;;  %v2275_v21 = vld [vmem:[#allocation10 + $0x68] sm:$0xff] }
 0x68d   :  { %v1790_v47 = vsub.f32 1.0, %v3579_v38  ;;  %v1792_v6 = vmul.f32 %v3579_v38, %v4255_v26  ;;  %v3457_v28 = vpack.c.bf16 %v2275_v21, %v2274_v16 }
 0x68e   :  { %v1788_v31 = vadd.f32 %v1787_v30, %v3985_v53  ;;  %v1848_v53 = vld [vmem:[%s4394_s4] sm:$0x7]  ;;  %v2276_v30 = vld [vmem:[#allocation10 + $0x70] sm:$0xff] }
 0x690   :  { %3580 = vtanh.f32 %v1788_v31  ;;  %v2277_v31 = vld [vmem:[#allocation10 + $0x78] sm:$0xff] }
 0x691   :  { %v3460_v38 = vpack.c.bf16 %v2277_v31, %v2276_v30 }
 0x69a   :  { %v3581_v49 = vpop.eup %3580 }
 0x69b   :  { %v1791_v60 = vmul.f32 %v3581_v49, %v1790_v47  ;;  %v2081_v47 = vld [vmem:[%s4394_s4] sm:$0x7] }
 0x69c   :  { %v2086_v49 = vrot.slane %v2081_v47, %v3989_v58 }
 0x69d   :  { %v4304_v44 = vadd.f32 %v1792_v6, %v1791_v60  ;;  %v2090_v60 = vrot.slane %v2081_v47, %v3996_v1 }
 0x69e   :  { %v3490_v6 = vadd.f32 %v2086_v49, %v4001_v5 }
 0x69f   :  { %1930 = vmatmul.mubr.f32.vlgmr.msra.gmra.mrb[12].mxu0 %v4304_v44  ;;  %2854 = vmatmul.mubr.f32.vlgmr.msra.gmra.mrb[20].mxu1 %v4304_v44 }
 0x6a0   :  { %3385 = vmatpush1.bf16.msra.mxu0 %v4117_v9  ;;  %3416 = vmatpush3.bf16.msra.mxu1 %v4120_v33  ;;  %v1853_v9 = vrot.slane %v1848_v53, %v3989_v58  ;;  %v1857_v33 = vrot.slane %v1848_v53, %v3996_v1  ;;  %v2094_v1 = vrot.slane %v2081_v47, %v3973_v37 }
 0x6a1   :  { %3387 = vmatprep.subr.bf16.mxu0 %v4124_v42  ;;  %3417 = vmatprep.subr.bf16.mxu1 %v3729_v40 }
 0x6a2   :  { %2162 = vmatprep.mubr.f32.mxu0 %v3728_v0  ;;  %2888 = vmatprep.mubr.msk.f32.mxu1 %vm3730_vm0, %v3728_v0  ;;  %v3486_v42 = vadd.f32 %v1853_v9, %v4001_v5  ;;  %v3492_v9 = vadd.f32 %v2090_v60, %v4005_v7 }
 0x6a4   :  { %3389 = vmatpush1.bf16.msra.mxu0 %v4127_v54  ;;  %3419 = vmatpush3.bf16.msra.mxu1 %v4130_v63 }
 0x6a5   :  { %3391 = vmatprep.subr.bf16.mxu0 %v4134_v11  ;;  %3420 = vmatprep.subr.bf16.mxu1 %v3729_v40  ;;  %v3488_v11 = vadd.f32 %v1857_v33, %v4005_v7 }
 0x6a8   :  { %3393 = vmatpush1.bf16.msra.mxu0 %v4137_v17  ;;  %3422 = vmatpush3.bf16.msra.mxu1 %v4140_v25 }
 0x6a9   :  { %3395 = vmatprep.subr.bf16.mxu0 %v4144_v35  ;;  %3423 = vmatprep.subr.bf16.mxu1 %v3729_v40 }
 0x6ac   :  { %3397 = vmatpush1.bf16.msra.mxu0 %v4147_v51  ;;  %3425 = vmatpush3.bf16.msra.mxu1 %v4150_v56 }
 0x6ad   :  { %3399 = vmatprep.subr.bf16.mxu0 %v4154_v4  ;;  %3426 = vmatprep.subr.bf16.mxu1 %v3729_v40 }
 0x6b0   :  { %3401 = vmatpush1.bf16.msra.mxu0 %v4157_v20  ;;  %3428 = vmatpush3.bf16.msra.mxu1 %v4160_v24 }
 0x6b1   :  { %3403 = vmatprep.subr.bf16.mxu0 %v4164_v14  ;;  %3429 = vmatprep.subr.bf16.mxu1 %v3729_v40 }
 0x6b4   :  { %3405 = vmatpush1.bf16.msra.mxu0 %v4167_v50  ;;  %3431 = vmatpush3.bf16.msra.mxu1 %v4169_v27  ;;  %v1861_v50 = vrot.slane %v1848_v53, %v3973_v37  ;;  %v2389_v37 = vld [vmem:[%s4396_s6] ss:$0 sm:$0xff] }
 0x6b5   :  { %3407 = vmatprep.subr.bf16.mxu0 %v4172_v36  ;;  %3432 = vmatprep.subr.bf16.mxu1 %v3729_v40 }
 0x6b8   :  { %3409 = vmatpush1.bf16.msra.mxu0 %v4175_v52  ;;  %3434 = vmatpush3.bf16.msra.mxu1 %v4179_v8 }
 0x6b9   :  { %3411 = vmatprep.subr.bf16.mxu0 %v4181_v12  ;;  %3435 = vmatprep.subr.bf16.mxu1 %v3729_v40 }
 0x6bc   :  { %3413 = vmatpush1.bf16.msra.mxu0 %v4185_v34  ;;  %3437 = vmatpush3.bf16.msra.mxu1 %v4189_v41 }
 0x6bd   :  { %3438 = vmatprep.subr.bf16.mxu0 %v3729_v40 }
 0x772   :  { %v1931_v54 = vpop.f32.mrb[12].mxu0  ;;  %v2002_v63 = vpop.f32.mrb[20].mxu1 }
 0x773   :  { %v3487_v17 = vadd.f32 %v3486_v42, %v1931_v54  ;;  %v1933_v25 = vpop.f32.mrb[13].mxu0  ;;  %v2855_v35 = vpop.f32.mrb[21].mxu1  ;;  %v2003_v36 = vadd.f32 %v2002_v63, %v1861_v50 }
 0x774   :  { %v3489_v56 = vadd.f32 %v3488_v11, %v1933_v25 }
 0x775   :  { %v2385_v51 = vmul.f32 -1.442695, %v3487_v17 }
 0x776   :  { %v2386_v4 = vmul.f32 -1.442695, %v3489_v56 }
 0x777   :  { %3582 = vpow2.f32 %v2385_v51 }
 0x778   :  { %3584 = vpow2.f32 %v2386_v4 }
 0x781   :  { %v3583_v20 = vpop.eup %3582 }
 0x782   :  { %v2010_v24 = vadd.f32 1.0, %v3583_v20  ;;  %v3585_v14 = vpop.eup %3584 }
 0x783   :  { %v2017_v27 = vadd.f32 1.0, %v3585_v14 }
 0x784   :  { %3586 = vrcp.f32 %v2010_v24 }
 0x785   :  { %3588 = vrcp.f32 %v2017_v27 }
 0x78e   :  { %v3587_v52 = vpop.eup %3586 }
 0x78f   :  { %v2020_v8 = vmul.f32 %v3587_v52, %v2003_v36  ;;  %v3589_v34 = vpop.eup %3588 }
 0x790   :  { %v2023_v41 = vsub.f32 1.0, %v3589_v34  ;;  %v2025_v26 = vmul.f32 %v3589_v34, %v4304_v44 }
 0x791   :  { %v2021_v12 = vadd.f32 %v2020_v8, %v3998_v3  ;;  %v2264_v3 = vld [vmem:[#allocation10 + $0x10] sm:$0xff] }
 0x792   :  { %v3442_v55 = vpack.c.bf16 %v2265_v45, %v2264_v3 }
 0x793   :  { %3590 = vtanh.f32 %v2021_v12 }
 0x79d   :  { %v3591_v59 = vpop.eup %3590 }
 0x79e   :  { %v2024_v18 = vmul.f32 %v3591_v59, %v2023_v41 }
 0x7a0   :  { %v4352_v57 = vadd.f32 %v2025_v26, %v2024_v18 }
 0x7a2   :  { %2163 = vmatmul.mubr.f32.vlgmr.msra.gmra.mrb[14].mxu0 %v4352_v57  ;;  %2889 = vmatmul.mubr.f32.vlgmr.msra.gmra.mrb[22].mxu1 %v4352_v57 }
 0x7a3   :  { %2923 = vmatprep.mubr.msk.f32.mxu0 %vm3730_vm0, %v3728_v0  ;;  %3440 = vmatpush3.bf16.msra.mxu0 %v3439_v19  ;;  %v2269_v0 = vld [vmem:[#allocation10 + $0x38] sm:$0xff] }
 0x7a4   :  { %3441 = vmatprep.subr.bf16.mxu0 %v3729_v40  ;;  %v3448_v22 = vpack.c.bf16 %v2269_v0, %v2268_v13 }
 0x7a7   :  { %3443 = vmatpush3.bf16.msra.mxu0 %v3442_v55 }
 0x7a8   :  { %3444 = vmatprep.subr.bf16.mxu0 %v3729_v40 }
 0x7ab   :  { %3446 = vmatpush3.bf16.msra.mxu0 %v3445_v10 }
 0x7ac   :  { %3447 = vmatprep.subr.bf16.mxu0 %v3729_v40 }
 0x7af   :  { %3449 = vmatpush3.bf16.msra.mxu0 %v3448_v22 }
 0x7b0   :  { %3450 = vmatprep.subr.bf16.mxu0 %v3729_v40 }
 0x7b3   :  { %3452 = vmatpush3.bf16.msra.mxu0 %v3451_v29 }
 0x7b4   :  { %3453 = vmatprep.subr.bf16.mxu0 %v3729_v40 }
 0x7b7   :  { %3455 = vmatpush3.bf16.msra.mxu0 %v3454_v39 }
 0x7b8   :  { %3456 = vmatprep.subr.bf16.mxu0 %v3729_v40 }
 0x7bb   :  { %3458 = vmatpush3.bf16.msra.mxu0 %v3457_v28 }
 0x7bc   :  { %3459 = vmatprep.subr.bf16.mxu0 %v3729_v40 }
 0x7bf   :  { %3461 = vmatpush3.bf16.msra.mxu0 %v3460_v38 }
 0x875   :  { %v2164_v44 = vpop.f32.mrb[14].mxu0  ;;  %v2235_v53 = vpop.f32.mrb[22].mxu1 }
 0x876   :  { %v3491_v33 = vadd.f32 %v3490_v6, %v2164_v44  ;;  %v2166_v42 = vpop.f32.mrb[15].mxu0  ;;  %v2890_v54 = vpop.f32.mrb[23].mxu1  ;;  %v2236_v5 = vadd.f32 %v2235_v53, %v2094_v1 }
 0x877   :  { %v3493_v40 = vadd.f32 %v3492_v9, %v2166_v42 }
 0x878   :  { %v2387_v63 = vmul.f32 -1.442695, %v3491_v33 }
 0x879   :  { %v2388_v11 = vmul.f32 -1.442695, %v3493_v40 }
 0x87a   :  { %3592 = vpow2.f32 %v2387_v63 }
 0x87b   :  { %3594 = vpow2.f32 %v2388_v11 }
 0x884   :  { %v3593_v17 = vpop.eup %3592 }
 0x885   :  { %v2243_v25 = vadd.f32 1.0, %v3593_v17  ;;  %v3595_v58 = vpop.eup %3594 }
 0x886   :  { %v2250_v35 = vadd.f32 1.0, %v3595_v58 }
 0x887   :  { %3596 = vrcp.f32 %v2243_v25 }
 0x888   :  { %3598 = vrcp.f32 %v2250_v35 }
 0x891   :  { %v3597_v51 = vpop.eup %3596 }
 0x892   :  { %v2253_v56 = vmul.f32 %v3597_v51, %v2236_v5  ;;  %v3599_v4 = vpop.eup %3598 }
 0x893   :  { %v2256_v20 = vsub.f32 1.0, %v3599_v4  ;;  %v2258_v50 = vmul.f32 %v3599_v4, %v4352_v57 }
 0x894   :  { %v2254_v7 = vadd.f32 %v2253_v56, %v3994_v62 }
 0x896   :  { %3600 = vtanh.f32 %v2254_v7 }
 0x8a0   :  { %v3601_v24 = vpop.eup %3600 }
 0x8a1   :  { %v2257_v14 = vmul.f32 %v3601_v24, %v2256_v20 }
 0x8a3   :  { %v2259_v27 = vadd.f32 %v2258_v50, %v2257_v14 }
 0x8a5   :  { %2924 = vmatmul.mubr.f32.vlgmr.msra.gmra.mrb[16].mxu0 %v2259_v27 }
 0x978   :  { %v2351_v36 = vpop.f32.mrb[16].mxu0 }
 0x979   :  { %v2352_v52 = vadd.f32 %v2389_v37, %v2351_v36  ;;  %v2925_v8 = vpop.f32.mrb[17].mxu0 }
 0x97b   :  { %2355 = vst [vmem:[#allocation12] sm:$0xff] %v2352_v52 }
 0x97c   :  { %3701 = shalt.err (!%p3698_p8)
}
 0x97d   :  { %s3702_s27 = scalar_lea.hbm %s4397_s7, 128 }
 0x97e   :  { %p3703_p9 = scmp.ne.s32.totalorder %s4397_s7, %s3702_s27  ;;  %p3706_p10 = scmp.lt.u32.totalorder %s3702_s27, %s4397_s7 }
 0x980   :  { %p3708_p11 = pnand %p3706_p10, %p3703_p9 }
 0x982   :  { %3711 = shalt.err (!%p3708_p11)
}
 0x983   :  { %2365 = dma.vmem_to_hbm [thread:$0]  %s2363_s22, 128, %s4397_s7, [#allocation6]  }
 0x984   :  { %3718 = dma.done.wait [#allocation6], 128  }
 0x985   :  { %3719 = vsyncadd [#allocation6], 4294967168 }
 0x986   :  { %2369 = vsyncpa [#allocation5], 1 }
 0x987   :  { %2370 = vsyncpa [#allocation8], 1 }
 0x988   :  { %2371 = vsyncpa [#allocation11], 1 }
 0x989   :  { %2372 = vsyncpa [#allocation6], 1 }

</bundles_post_ra>
